<compile_context>
chip_gen: v7x
topology: tpu7x:2x2x1
jax: 0.10.0
libtpu: 0.0.40
codegen_flags: <defaults>
</compile_context>

<pallas_src>
import math
import functools
import numpy as np

import jax
import jax.numpy as jnp
from jax import lax
from jax.experimental import pallas as pl
from jax.experimental.pallas import tpu as pltpu

_EPS = 1e-5                       # PyTorch GroupNorm default eps
_INV_SQRT2 = 1.0 / math.sqrt(2.0)


# --------------------------------------------------------------------------
# the single fused forward kernel (one grid step == Bt batch elements)
# --------------------------------------------------------------------------
def _fused_forward_kernel(has_head, gc, skiprescale, NB, H, W, Bt, C, offs,
                          t_ref, x_ref, cp_ref, hw_ref, wk_ref, tw_ref,
                          fcw_ref, sn_ref, o_ref):
    HW = H * W
    P = Bt * HW

    cp = cp_ref[...]                                  # (R, 1) packed column constants
    sn = sn_ref[...]                                  # (P, Bt) per-sample mean matrix (1/HW)

    def col(name):
        s, n = offs[name]
        return cp[s:s + n]                            # (n, 1)

    def blk_col(name, blk, ci):
        s, _ = offs[name]
        o = s + (blk * 2 + ci) * C
        return cp[o:o + C]                            # (C, 1)

    def seg_bcast(a):
        """(Cv, Bt) -> (Cv, P): each sample's scalar fills its HW lane segment.
        Exact (no matmul), cheap lane broadcast + lane concat."""
        if Bt == 1:
            return a                                  # jnp broadcasting handles (Cv,1)
        parts = [jnp.broadcast_to(a[:, b:b + 1], (a.shape[0], HW))
                 for b in range(Bt)]
        return jnp.concatenate(parts, axis=1)

    def lroll(v, s):
        s = s % P
        if s == 0:
            return v
        if P % 128 == 0:
            return pltpu.roll(v, shift=s, axis=1)     # single XLU vrot
        return jnp.roll(v, s, axis=1)

    def group_norm(v, gamma, beta):
        """Per-sample GroupNorm on the lane-folded (Cv, Bt*HW) layout;
        one-pass variance, per-channel stats via MXU segment matmuls."""
        Cv = v.shape[0]
        cg = gc if (gc >= 1 and Cv % gc == 0) else 1
        m1 = jnp.dot(v, sn, preferred_element_type=jnp.float32)        # (Cv, Bt)
        m2 = jnp.dot(v * v, sn, preferred_element_type=jnp.float32)    # (Cv, Bt)
        if cg > 1:
            G = Cv // cg
            m1 = jnp.mean(m1.reshape(G, cg, Bt), axis=1)
            m2 = jnp.mean(m2.reshape(G, cg, Bt), axis=1)
            m1 = jnp.broadcast_to(m1[:, None, :], (G, cg, Bt)).reshape(Cv, Bt)
            m2 = jnp.broadcast_to(m2[:, None, :], (G, cg, Bt)).reshape(Cv, Bt)
        inv = lax.rsqrt(m2 - m1 * m1 + _EPS)
        a = gamma * inv                                                # (Cv, Bt)
        b = beta - m1 * a
        return v * seg_bcast(a) + seg_bcast(b)

    # ---- continuous gaussian-fourier time embedding + all temb projections ----
    f = col("fourier") * t_ref[...]                    # (E/2,1)*(1,Bt) -> (E/2, Bt)
    temb = jnp.concatenate([jnp.sin(f), jnp.cos(f)], axis=0)           # (E, Bt)
    tproj = jnp.dot(tw_ref[...], temb,
                    preferred_element_type=jnp.float32) + col("tb")    # (NB*C, Bt)

    # ---- head NormConv2d (GroupNorm -> 1x1 conv) ----
    # TODO(synk): NormConv2d source unavailable; implemented as GN(in_ch) -> 1x1 conv.
    if has_head:
        xn = group_norm(x_ref[...], col("head_g"), col("head_b"))
        h = jnp.dot(hw_ref[...], xn,
                    preferred_element_type=jnp.float32) + col("head_bias")
    else:
        h = x_ref[...]

    # ---- circular-pad wrap masks (loop-invariant, hoisted; bitwise, no modulo) ----
    def wrapi(idx, m):
        return (idx & (m - 1)) if (m & (m - 1)) == 0 else (idx % m)

    laneC = lax.broadcasted_iota(jnp.int32, (C, P), 1)
    posC = wrapi(laneC, HW)
    wC = wrapi(posC, W)
    mask_w_lo = wC == 0
    mask_w_hi = wC == W - 1
    if Bt > 1:
        lane3 = lax.broadcasted_iota(jnp.int32, (3 * C, P), 1)
        pos3 = wrapi(lane3, HW)
        mask_h_lo = pos3 < W                 # h == 0 rows (per sample)
        mask_h_hi = pos3 >= HW - W           # h == H-1 rows (per sample)

    s_left, s_left_w = 1, (1 - W) % P
    s_right, s_right_w = P - 1, (W - 1) % P
    s_up, s_up_w = W % P, (W - HW) % P
    s_dn, s_dn_w = (P - W) % P, (HW - W) % P

    wk = wk_ref[...]                         # (NB*2*3, C, 3C) ky-major im2col weights

    def conv3x3(v, widx):
        """Conv2d(k=3, s=1, padding=1, padding_mode='circular') on the lane-folded
        layout: 3 accumulated (C,3C)x(3C,P) MXU matmuls (one per ky)."""
        xm = jnp.where(mask_w_lo, lroll(v, s_left_w), lroll(v, s_left))
        xp = jnp.where(mask_w_hi, lroll(v, s_right_w), lroll(v, s_right))
        x3 = jnp.concatenate([xm, v, xp], axis=0)      # rows: (dx, cin)
        if Bt == 1:
            x3u = lroll(x3, s_up)                      # pure circular, no sample leak
            x3d = lroll(x3, s_dn)
        else:
            x3u = jnp.where(mask_h_lo, lroll(x3, s_up_w), lroll(x3, s_up))
            x3d = jnp.where(mask_h_hi, lroll(x3, s_dn_w), lroll(x3, s_dn))
        acc = jnp.dot(wk[widx + 0], x3u, preferred_element_type=jnp.float32)
        acc = acc + jnp.dot(wk[widx + 1], x3, preferred_element_type=jnp.float32)
        acc = acc + jnp.dot(wk[widx + 2], x3d, preferred_element_type=jnp.float32)
        return acc

    # ---- DownResBlocks (activations stay resident across blocks) ----
    # TODO(synk): DownResBlock source unavailable; standard DDPM resblock assumed:
    #   conv(silu(GN(x))) + temb_proj, conv(silu(GN(.))), residual add, /sqrt(2).
    for blk in range(NB):
        r = jax.nn.silu(group_norm(h, blk_col("gn_g", blk, 0),
                                   blk_col("gn_b", blk, 0)))
        r = conv3x3(r, (blk * 2 + 0) * 3)
        addv = blk_col("bconv", blk, 0) + tproj[blk * C:(blk + 1) * C]   # (C, Bt)
        r = r + seg_bcast(addv)
        r = jax.nn.silu(group_norm(r, blk_col("gn_g", blk, 1),
                                   blk_col("gn_b", blk, 1)))
        r = conv3x3(r, (blk * 2 + 1) * 3)
        r = r + blk_col("bconv", blk, 1)
        h = h + r
        if skiprescale:
            h = h * _INV_SQRT2

    # ---- adaptive_avg_pool2d(1) + fc tail (order==2 symmetrization folded) ----
    # F.dropout(p=0.0) is the identity.  TODO(synk): dropout > 0 not implemented.
    pooled = jnp.dot(h, sn, preferred_element_type=jnp.float32)          # (C, Bt)
    o_ref[...] = jnp.dot(fcw_ref[...], pooled,
                         preferred_element_type=jnp.float32) + col("fc_b")


# --------------------------------------------------------------------------
# wrapper
# --------------------------------------------------------------------------
def tparam_moment_forward(params, x, t, cfg):
    B, Cin, H, W = x.shape
    C = cfg["first_channels"]
    NB = cfg["num_blocks"]
    gc = cfg["group_c"]
    d = cfg["dim_param"]
    order = cfg["order"]
    out_dim = d ** order
    has_head = Cin != C
    HW = H * W

    # ---- batch folding: Bt samples share one grid step on the lane axis ----
    max_lanes = 2048                     # cap on P = Bt*HW (x3 vreg pressure)
    if B >= 2:
        Bt = max(1, min(B // 2, max(1, max_lanes // HW)))   # keep >=2 grid steps (v7x)
    else:
        Bt = 1
    nt = -(-B // Bt)
    Bpad = nt * Bt
    P = Bt * HW

    if Bpad != B:
        x = jnp.concatenate(
            [x, jnp.zeros((Bpad - B,) + x.shape[1:], x.dtype)], axis=0)
        t = jnp.concatenate(
            [t, jnp.zeros((Bpad - B,) + t.shape[1:], t.dtype)], axis=0)

    # lane-dense layout: (tile, Cin, Bt*HW); samples contiguous on the lane axis
    x_l = x.reshape(nt, Bt, Cin, HW).transpose(0, 2, 1, 3).reshape(nt, Cin, P)
    t_l = t.reshape(nt, Bt)[:, None, :]                      # (nt, 1, Bt)

    # per-sample mean matrix (P, Bt): 1/HW on the sample's own lanes
    seg = np.arange(P) // HW
    sn = jnp.asarray(
        (seg[:, None] == np.arange(Bt)[None, :]).astype(np.float32) / HW)

    # ---- pack all tiny (rows,1) constants into one column slab ----
    offs = {}
    segs = []
    cur = 0

    def _add(name, arr):
        nonlocal cur
        v = jnp.asarray(arr, jnp.float32).reshape(-1)
        n = int(v.shape[0])
        offs[name] = (cur, n)
        pn = -(-n // 8) * 8                 # keep segment offsets sublane-aligned
        if pn != n:
            v = jnp.concatenate([v, jnp.zeros((pn - n,), jnp.float32)])
        segs.append(v)
        cur += pn

    _add("fourier", params["fourier_w"])
    _add("gn_g", params["gn_g"])
    _add("gn_b", params["gn_b"])
    _add("bconv", params["bconv"])
    _add("tb", params["tb"])
    _add("fc_b", params["fc_b_fold"])
    if has_head:
        _add("head_g", params["head"]["gamma"])
        _add("head_b", params["head"]["beta"])
        _add("head_bias", params["head"]["b"])
        head_w = params["head"]["w"]
    else:
        head_w = jnp.zeros((1, 1), jnp.float32)
    colpack = jnp.concatenate(segs).reshape(-1, 1)

    # 3x3 conv weights, ky-major im2col layout: (NB*2*3, Cout, 3*Cin),
    # columns ordered (kx, cin) to match the stacked shifted views in-kernel.
    wk = jnp.transpose(params["wconv_raw"], (0, 1, 4, 2, 5, 3)).reshape(
        NB * 2 * 3, C, 3 * C)

    kern = functools.partial(
        _fused_forward_kernel, has_head, gc, bool(cfg["skiprescale"]),
        NB, H, W, Bt, C, offs)

    def cspec(a):
        return pl.BlockSpec(a.shape, lambda b, n=a.ndim: (0,) * n)

    const_args = (colpack, head_w, wk, params["tw"], params["fc_w_fold"], sn)

    out = pl.pallas_call(
        kern,
        out_shape=jax.ShapeDtypeStruct((nt, out_dim, Bt), jnp.float32),
        grid=(nt,),
        in_specs=[
            pl.BlockSpec((None, 1, Bt), lambda b: (b, 0, 0)),        # t
            pl.BlockSpec((None, Cin, P), lambda b: (b, 0, 0)),       # x (lane-dense)
        ] + [cspec(a) for a in const_args],
        out_specs=pl.BlockSpec((None, out_dim, Bt), lambda b: (b, 0, 0)),
        compiler_params=pltpu.CompilerParams(
            dimension_semantics=("parallel",)),    # v7x: both TCs get grid steps
    )(t_l, x_l, *const_args)

    y = jnp.transpose(out, (0, 2, 1)).reshape(Bpad, out_dim)[:B]
    if order == 2:
        y = y.reshape(B, d, d)
    return y


# --------------------------------------------------------------------------
# parameters
# --------------------------------------------------------------------------
def init_params(key, cfg):
    Cin = cfg["in_channels"]
    C = cfg["first_channels"]
    E = cfg["time_embed_dim"]
    d = cfg["dim_param"]
    order = cfg["order"]
    NB = cfg["num_blocks"]
    out_dim = d ** order

    keys = iter(jax.random.split(key, 128))

    def nrm(shape, scale):
        return (scale * jax.random.normal(next(keys), shape)).astype(jnp.float32)

    params = {}
    # fixed gaussian-fourier frequencies (Linear(1, E/2) weight, zero bias)
    # TODO(synk): gaussian_fourier_embedding scale inferred (randn * 16).
    params["fourier_w"] = nrm((1, E // 2), 16.0)

    if Cin != C:
        params["head"] = dict(
            gamma=jnp.ones((Cin, 1), jnp.float32),
            beta=jnp.zeros((Cin, 1), jnp.float32),
            w=nrm((C, Cin), 1.0 / math.sqrt(Cin)),
            b=nrm((C, 1), 0.01),
        )

    # residual-block conv weights, stacked over (block, conv_index)
    params["wconv_raw"] = nrm((NB, 2, C, C, 3, 3), 1.0 / math.sqrt(C * 9))
    params["bconv"] = nrm((NB, 2, C, 1), 0.01)
    params["gn_g"] = jnp.ones((NB, 2, C, 1), jnp.float32)
    params["gn_b"] = jnp.zeros((NB, 2, C, 1), jnp.float32)

    # all blocks' time-embedding projections stacked: Linear(E, NB*C)
    params["tw"] = nrm((NB * C, E), 1.0 / math.sqrt(E))
    params["tb"] = nrm((NB * C, 1), 0.01)

    # fc tail; for order == 2 the symmetrization is folded into weight & bias.
    fc_w = nrm((out_dim, C), 1.0 / math.sqrt(C))
    fc_b = nrm((out_dim, 1), 0.01)
    params["fc_w"] = fc_w
    params["fc_b"] = fc_b
    if order == 2:
        Pm = np.zeros((out_dim, out_dim), np.float32)
        for i in range(d):
            for j in range(d):
                Pm[i * d + j, j * d + i] = 1.0
        Pm = jnp.asarray(Pm)
        params["fc_w_fold"] = 0.5 * (fc_w + Pm @ fc_w)
        params["fc_b_fold"] = 0.5 * (fc_b + Pm @ fc_b)
    else:
        params["fc_w_fold"] = fc_w
        params["fc_b_fold"] = fc_b
    return params


# --------------------------------------------------------------------------
# pure-JAX reference (uses the raw / unfolded parameters) for verification
# --------------------------------------------------------------------------
def reference_forward(params, x, t, cfg):
    B, Cin, H, W = x.shape
    C = cfg["first_channels"]
    gc = cfg["group_c"]
    NB = cfg["num_blocks"]
    d = cfg["dim_param"]
    order = cfg["order"]

    f = t * params["fourier_w"]                           # (B, E/2)
    temb = jnp.concatenate([jnp.sin(f), jnp.cos(f)], axis=-1)

    def gn(v, gamma, beta, groups):
        Bv, Cv, Hv, Wv = v.shape
        vg = v.reshape(Bv, groups, -1)
        m = vg.mean(axis=-1, keepdims=True)
        s = vg.var(axis=-1, keepdims=True)
        vn = ((vg - m) / jnp.sqrt(s + _EPS)).reshape(Bv, Cv, Hv, Wv)
        return vn * gamma.reshape(1, Cv, 1, 1) + beta.reshape(1, Cv, 1, 1)

    def circ_conv3x3(v, w, bias):
        Cout = w.shape[0]
        acc = jnp.zeros((v.shape[0], Cout, v.shape[2], v.shape[3]), jnp.float32)
        for ky in range(3):
            for kx in range(3):
                sh = jnp.roll(jnp.roll(v, -(ky - 1), axis=2), -(kx - 1), axis=3)
                acc = acc + jnp.einsum("oi,bihw->bohw", w[:, :, ky, kx], sh)
        return acc + bias.reshape(1, Cout, 1, 1)

    if Cin != C:
        hp = params["head"]
        h = gn(x, hp["gamma"], hp["beta"], Cin // gc)
        h = jnp.einsum("oi,bihw->bohw", hp["w"], h) + hp["b"].reshape(1, -1, 1, 1)
    else:
        h = x
    Cc = h.shape[1]

    for blk in range(NB):
        r = jax.nn.silu(gn(h, params["gn_g"][blk, 0], params["gn_b"][blk, 0], Cc // gc))
        r = circ_conv3x3(r, params["wconv_raw"][blk, 0], params["bconv"][blk, 0])
        tw = params["tw"][blk * Cc:(blk + 1) * Cc]
        tb = params["tb"][blk * Cc:(blk + 1) * Cc, 0]
        r = r + (temb @ tw.T + tb)[:, :, None, None]
        r = jax.nn.silu(gn(r, params["gn_g"][blk, 1], params["gn_b"][blk, 1], Cc // gc))
        r = circ_conv3x3(r, params["wconv_raw"][blk, 1], params["bconv"][blk, 1])
        h = h + r
        if cfg["skiprescale"]:
            h = h / math.sqrt(2.0)

    pooled = h.mean(axis=(2, 3))
    y = pooled @ params["fc_w"].T + params["fc_b"][:, 0]
    if order == 2:
        y = y.reshape(B, d, d)
        y = 0.5 * (y + jnp.swapaxes(y, 1, 2))
    return y


# --------------------------------------------------------------------------
if __name__ == "__main__":
    cfg = dict(in_channels=4, in_size=16, dim_param=3, order=2, num_blocks=2,
               first_channels=8, time_embed_dim=32, padding_mode="circular",
               normalize="GN", group_c=1, skiprescale=True,
               discretization="continuous", embedding_mode=None, dropout=0.0)

    key = jax.random.PRNGKey(0)
    kp, kx, kt = jax.random.split(key, 3)
    params = init_params(kp, cfg)

    # primary check: B=2 (Bt=1, two parallel grid steps)
    x = jax.random.normal(kx, (2, cfg["in_channels"], cfg["in_size"], cfg["in_size"]),
                          dtype=jnp.float32)
    t = jax.random.uniform(kt, (2, 1), dtype=jnp.float32)
    out = jax.block_until_ready(tparam_moment_forward(params, x, t, cfg))
    ref = reference_forward(params, x, t, cfg)
    assert out.shape == (2, cfg["dim_param"], cfg["dim_param"])
    assert bool(jnp.all(jnp.isfinite(out)))
    assert bool(jnp.allclose(out, ref, rtol=1e-3, atol=2e-3)), (out, ref)
    assert bool(jnp.allclose(out, jnp.swapaxes(out, 1, 2), atol=1e-5))

    # secondary check: B=8 exercises the lane-folded batch path (Bt=4 per step)
    kx2, kt2 = jax.random.split(kx)
    x8 = jax.random.normal(kx2, (8, cfg["in_channels"], cfg["in_size"], cfg["in_size"]),
                           dtype=jnp.float32)
    t8 = jax.random.uniform(kt2, (8, 1), dtype=jnp.float32)
    out8 = jax.block_until_ready(tparam_moment_forward(params, x8, t8, cfg))
    ref8 = reference_forward(params, x8, t8, cfg)
    assert out8.shape == (8, cfg["dim_param"], cfg["dim_param"])
    assert bool(jnp.all(jnp.isfinite(out8)))
    assert bool(jnp.allclose(out8, ref8, rtol=1e-3, atol=2e-3)), (out8, ref8)

    print("KERNEL_OK")
</pallas_src>

<mosaic_0001>
module attributes {stable_mosaic.version = 11 : i64} {
  func.func @_fused_forward_kernel(%arg0: i32, %arg1: memref<1x1x1xf32, #tpu.memory_space<vmem>>, %arg2: memref<1x4x256xf32, #tpu.memory_space<vmem>>, %arg3: memref<168x1xf32, #tpu.memory_space<vmem>>, %arg4: memref<8x4xf32, #tpu.memory_space<vmem>>, %arg5: memref<12x8x24xf32, #tpu.memory_space<vmem>>, %arg6: memref<16x32xf32, #tpu.memory_space<vmem>>, %arg7: memref<9x8xf32, #tpu.memory_space<vmem>>, %arg8: memref<256x1xf32, #tpu.memory_space<vmem>>, %arg9: memref<1x9x1xf32, #tpu.memory_space<vmem>>) attributes {dimension_semantics = [#tpu.dimension_semantics<parallel>], iteration_bounds = array<i64: 2>, scalar_prefetch = 0 : i64, scratch_operands = 0 : i64, tpu.core_type = #tpu.core_type<tc>, window_params = [{transform_indices = @transform_0, window_bounds = array<i64: 1, 1, 1>}, {transform_indices = @transform_1, window_bounds = array<i64: 1, 4, 256>}, {pipeline_mode = #tpu.pipeline_mode<synchronous>, transform_indices = @transform_2, window_bounds = array<i64: 168, 1>}, {pipeline_mode = #tpu.pipeline_mode<synchronous>, transform_indices = @transform_3, window_bounds = array<i64: 8, 4>}, {pipeline_mode = #tpu.pipeline_mode<synchronous>, transform_indices = @transform_4, window_bounds = array<i64: 12, 8, 24>}, {pipeline_mode = #tpu.pipeline_mode<synchronous>, transform_indices = @transform_5, window_bounds = array<i64: 16, 32>}, {pipeline_mode = #tpu.pipeline_mode<synchronous>, transform_indices = @transform_6, window_bounds = array<i64: 9, 8>}, {pipeline_mode = #tpu.pipeline_mode<synchronous>, transform_indices = @transform_7, window_bounds = array<i64: 256, 1>}, {transform_indices = @transform_8, window_bounds = array<i64: 1, 9, 1>}]} {
    %c0 = arith.constant 0 : index
    %c0_0 = arith.constant 0 : index
    %0 = vector.load %arg3[%c0, %c0_0] : memref<168x1xf32, #tpu.memory_space<vmem>>, vector<168x1xf32>
    %c0_1 = arith.constant 0 : index
    %c0_2 = arith.constant 0 : index
    %1 = vector.load %arg8[%c0_1, %c0_2] : memref<256x1xf32, #tpu.memory_space<vmem>>, vector<256x1xf32>
    %2 = vector.extract_strided_slice %0 {offsets = [0, 0], sizes = [16, 1], strides = [1, 1]} : vector<168x1xf32> to vector<16x1xf32>
    %c0_3 = arith.constant 0 : index
    %c0_4 = arith.constant 0 : index
    %c0_5 = arith.constant 0 : index
    %3 = vector.load %arg1[%c0_3, %c0_4, %c0_5] : memref<1x1x1xf32, #tpu.memory_space<vmem>>, vector<1x1x1xf32>
    %4 = vector.shape_cast %3 : vector<1x1x1xf32> to vector<1x1xf32>
    %5 = vector.broadcast %4 : vector<1x1xf32> to vector<16x1xf32>
    %6 = arith.mulf %2, %5 : vector<16x1xf32>
    %7 = math.sin %6 : vector<16x1xf32>
    %8 = math.cos %6 : vector<16x1xf32>
    %9 = tpu.concatenate %7, %8 in 0 : vector<16x1xf32>, vector<16x1xf32> -> vector<32x1xf32>
    %c0_6 = arith.constant 0 : index
    %c0_7 = arith.constant 0 : index
    %10 = vector.load %arg6[%c0_6, %c0_7] : memref<16x32xf32, #tpu.memory_space<vmem>>, vector<16x32xf32>
    %cst = arith.constant dense<0.000000e+00> : vector<16x1xf32>
    %11 = tpu.matmul %10, %9, %cst {dimension_numbers = #tpu.dot_dimension_numbers<[1], [0], [0], [1], [0, 0, 1, 1], [], []>} : vector<16x32xf32>, vector<32x1xf32>, vector<16x1xf32> -> vector<16x1xf32>
    %12 = vector.extract_strided_slice %0 {offsets = [112, 0], sizes = [16, 1], strides = [1, 1]} : vector<168x1xf32> to vector<16x1xf32>
    %13 = arith.addf %11, %12 : vector<16x1xf32>
    %c0_8 = arith.constant 0 : index
    %c0_9 = arith.constant 0 : index
    %c0_10 = arith.constant 0 : index
    %14 = vector.load %arg2[%c0_8, %c0_9, %c0_10] : memref<1x4x256xf32, #tpu.memory_space<vmem>>, vector<1x4x256xf32>
    %15 = vector.shape_cast %14 : vector<1x4x256xf32> to vector<4x256xf32>
    %16 = vector.extract_strided_slice %0 {offsets = [144, 0], sizes = [4, 1], strides = [1, 1]} : vector<168x1xf32> to vector<4x1xf32>
    %17 = vector.extract_strided_slice %0 {offsets = [152, 0], sizes = [4, 1], strides = [1, 1]} : vector<168x1xf32> to vector<4x1xf32>
    %cst_11 = arith.constant dense<0.000000e+00> : vector<4x1xf32>
    %18 = tpu.matmul %15, %1, %cst_11 {dimension_numbers = #tpu.dot_dimension_numbers<[1], [0], [0], [1], [0, 0, 1, 1], [], []>} : vector<4x256xf32>, vector<256x1xf32>, vector<4x1xf32> -> vector<4x1xf32>
    %19 = arith.mulf %15, %15 : vector<4x256xf32>
    %cst_12 = arith.constant dense<0.000000e+00> : vector<4x1xf32>
    %20 = tpu.matmul %19, %1, %cst_12 {dimension_numbers = #tpu.dot_dimension_numbers<[1], [0], [0], [1], [0, 0, 1, 1], [], []>} : vector<4x256xf32>, vector<256x1xf32>, vector<4x1xf32> -> vector<4x1xf32>
    %21 = arith.mulf %18, %18 : vector<4x1xf32>
    %22 = arith.subf %20, %21 : vector<4x1xf32>
    %cst_13 = arith.constant 9.99999974E-6 : f32
    %23 = vector.broadcast %cst_13 : f32 to vector<4x1xf32>
    %24 = arith.addf %22, %23 : vector<4x1xf32>
    %25 = math.rsqrt %24 : vector<4x1xf32>
    %26 = arith.mulf %16, %25 : vector<4x1xf32>
    %27 = arith.mulf %18, %26 : vector<4x1xf32>
    %28 = arith.subf %17, %27 : vector<4x1xf32>
    %29 = vector.broadcast %26 : vector<4x1xf32> to vector<4x256xf32>
    %30 = arith.mulf %15, %29 : vector<4x256xf32>
    %31 = vector.broadcast %28 : vector<4x1xf32> to vector<4x256xf32>
    %32 = arith.addf %30, %31 : vector<4x256xf32>
    %c0_14 = arith.constant 0 : index
    %c0_15 = arith.constant 0 : index
    %33 = vector.load %arg4[%c0_14, %c0_15] : memref<8x4xf32, #tpu.memory_space<vmem>>, vector<8x4xf32>
    %cst_16 = arith.constant dense<0.000000e+00> : vector<8x256xf32>
    %34 = tpu.matmul %33, %32, %cst_16 {dimension_numbers = #tpu.dot_dimension_numbers<[1], [0], [0], [1], [0, 0, 1, 1], [], []>} : vector<8x4xf32>, vector<4x256xf32>, vector<8x256xf32> -> vector<8x256xf32>
    %35 = vector.extract_strided_slice %0 {offsets = [160, 0], sizes = [8, 1], strides = [1, 1]} : vector<168x1xf32> to vector<8x1xf32>
    %36 = vector.broadcast %35 : vector<8x1xf32> to vector<8x256xf32>
    %37 = arith.addf %34, %36 : vector<8x256xf32>
    %38 = tpu.iota {dimensions = array<i32: 1>} : vector<8x256xi32>
    %c255_i32 = arith.constant 255 : i32
    %39 = vector.broadcast %c255_i32 : i32 to vector<8x256xi32>
    %40 = arith.andi %38, %39 : vector<8x256xi32>
    %c15_i32 = arith.constant 15 : i32
    %41 = vector.broadcast %c15_i32 : i32 to vector<8x256xi32>
    %42 = arith.andi %40, %41 : vector<8x256xi32>
    %c0_i32 = arith.constant 0 : i32
    %43 = vector.broadcast %c0_i32 : i32 to vector<8x256xi32>
    %44 = arith.cmpi eq, %42, %43 : vector<8x256xi32>
    %c15_i32_17 = arith.constant 15 : i32
    %45 = vector.broadcast %c15_i32_17 : i32 to vector<8x256xi32>
    %46 = arith.cmpi eq, %42, %45 : vector<8x256xi32>
    %c0_18 = arith.constant 0 : index
    %c0_19 = arith.constant 0 : index
    %c0_20 = arith.constant 0 : index
    %47 = vector.load %arg5[%c0_18, %c0_19, %c0_20] : memref<12x8x24xf32, #tpu.memory_space<vmem>>, vector<12x8x24xf32>
    %48 = vector.extract_strided_slice %0 {offsets = [16, 0], sizes = [8, 1], strides = [1, 1]} : vector<168x1xf32> to vector<8x1xf32>
    %49 = vector.extract_strided_slice %0 {offsets = [48, 0], sizes = [8, 1], strides = [1, 1]} : vector<168x1xf32> to vector<8x1xf32>
    %cst_21 = arith.constant dense<0.000000e+00> : vector<8x1xf32>
    %50 = tpu.matmul %37, %1, %cst_21 {dimension_numbers = #tpu.dot_dimension_numbers<[1], [0], [0], [1], [0, 0, 1, 1], [], []>} : vector<8x256xf32>, vector<256x1xf32>, vector<8x1xf32> -> vector<8x1xf32>
    %51 = arith.mulf %37, %37 : vector<8x256xf32>
    %cst_22 = arith.constant dense<0.000000e+00> : vector<8x1xf32>
    %52 = tpu.matmul %51, %1, %cst_22 {dimension_numbers = #tpu.dot_dimension_numbers<[1], [0], [0], [1], [0, 0, 1, 1], [], []>} : vector<8x256xf32>, vector<256x1xf32>, vector<8x1xf32> -> vector<8x1xf32>
    %53 = arith.mulf %50, %50 : vector<8x1xf32>
    %54 = arith.subf %52, %53 : vector<8x1xf32>
    %cst_23 = arith.constant 9.99999974E-6 : f32
    %55 = vector.broadcast %cst_23 : f32 to vector<8x1xf32>
    %56 = arith.addf %54, %55 : vector<8x1xf32>
    %57 = math.rsqrt %56 : vector<8x1xf32>
    %58 = arith.mulf %48, %57 : vector<8x1xf32>
    %59 = arith.mulf %50, %58 : vector<8x1xf32>
    %60 = arith.subf %49, %59 : vector<8x1xf32>
    %61 = vector.broadcast %58 : vector<8x1xf32> to vector<8x256xf32>
    %62 = arith.mulf %37, %61 : vector<8x256xf32>
    %63 = vector.broadcast %60 : vector<8x1xf32> to vector<8x256xf32>
    %64 = arith.addf %62, %63 : vector<8x256xf32>
    %65 = arith.negf %64 : vector<8x256xf32>
    %66 = math.exp %65 : vector<8x256xf32>
    %cst_24 = arith.constant 1.000000e+00 : f32
    %67 = vector.broadcast %cst_24 : f32 to vector<8x256xf32>
    %68 = arith.addf %67, %66 : vector<8x256xf32>
    %69 = arith.divf %67, %68 : vector<8x256xf32>
    %70 = arith.mulf %64, %69 : vector<8x256xf32>
    %c241_i32 = arith.constant 241 : i32
    %71 = tpu.dynamic_rotate %70 by %c241_i32 dim 1 : vector<8x256xf32>, i32 -> vector<8x256xf32>
    %c1_i32 = arith.constant 1 : i32
    %72 = tpu.dynamic_rotate %70 by %c1_i32 dim 1 : vector<8x256xf32>, i32 -> vector<8x256xf32>
    %73 = arith.select %44, %71, %72 : vector<8x256xi1>, vector<8x256xf32>
    %c15_i32_25 = arith.constant 15 : i32
    %74 = tpu.dynamic_rotate %70 by %c15_i32_25 dim 1 : vector<8x256xf32>, i32 -> vector<8x256xf32>
    %c255_i32_26 = arith.constant 255 : i32
    %75 = tpu.dynamic_rotate %70 by %c255_i32_26 dim 1 : vector<8x256xf32>, i32 -> vector<8x256xf32>
    %76 = arith.select %46, %74, %75 : vector<8x256xi1>, vector<8x256xf32>
    %77 = tpu.concatenate %73, %70, %76 in 0 : vector<8x256xf32>, vector<8x256xf32>, vector<8x256xf32> -> vector<24x256xf32>
    %c16_i32 = arith.constant 16 : i32
    %78 = tpu.dynamic_rotate %77 by %c16_i32 dim 1 : vector<24x256xf32>, i32 -> vector<24x256xf32>
    %c240_i32 = arith.constant 240 : i32
    %79 = tpu.dynamic_rotate %77 by %c240_i32 dim 1 : vector<24x256xf32>, i32 -> vector<24x256xf32>
    %80 = vector.extract_strided_slice %47 {offsets = [0, 0, 0], sizes = [1, 8, 24], strides = [1, 1, 1]} : vector<12x8x24xf32> to vector<1x8x24xf32>
    %81 = vector.shape_cast %80 : vector<1x8x24xf32> to vector<8x24xf32>
    %cst_27 = arith.constant dense<0.000000e+00> : vector<8x256xf32>
    %82 = tpu.matmul %81, %78, %cst_27 {dimension_numbers = #tpu.dot_dimension_numbers<[1], [0], [0], [1], [0, 0, 1, 1], [], []>} : vector<8x24xf32>, vector<24x256xf32>, vector<8x256xf32> -> vector<8x256xf32>
    %83 = vector.extract_strided_slice %47 {offsets = [1, 0, 0], sizes = [1, 8, 24], strides = [1, 1, 1]} : vector<12x8x24xf32> to vector<1x8x24xf32>
    %84 = vector.shape_cast %83 : vector<1x8x24xf32> to vector<8x24xf32>
    %cst_28 = arith.constant dense<0.000000e+00> : vector<8x256xf32>
    %85 = tpu.matmul %84, %77, %cst_28 {dimension_numbers = #tpu.dot_dimension_numbers<[1], [0], [0], [1], [0, 0, 1, 1], [], []>} : vector<8x24xf32>, vector<24x256xf32>, vector<8x256xf32> -> vector<8x256xf32>
    %86 = arith.addf %82, %85 : vector<8x256xf32>
    %87 = vector.extract_strided_slice %47 {offsets = [2, 0, 0], sizes = [1, 8, 24], strides = [1, 1, 1]} : vector<12x8x24xf32> to vector<1x8x24xf32>
    %88 = vector.shape_cast %87 : vector<1x8x24xf32> to vector<8x24xf32>
    %cst_29 = arith.constant dense<0.000000e+00> : vector<8x256xf32>
    %89 = tpu.matmul %88, %79, %cst_29 {dimension_numbers = #tpu.dot_dimension_numbers<[1], [0], [0], [1], [0, 0, 1, 1], [], []>} : vector<8x24xf32>, vector<24x256xf32>, vector<8x256xf32> -> vector<8x256xf32>
    %90 = arith.addf %86, %89 : vector<8x256xf32>
    %91 = vector.extract_strided_slice %0 {offsets = [80, 0], sizes = [8, 1], strides = [1, 1]} : vector<168x1xf32> to vector<8x1xf32>
    %92 = vector.extract_strided_slice %13 {offsets = [0, 0], sizes = [8, 1], strides = [1, 1]} : vector<16x1xf32> to vector<8x1xf32>
    %93 = arith.addf %91, %92 : vector<8x1xf32>
    %94 = vector.broadcast %93 : vector<8x1xf32> to vector<8x256xf32>
    %95 = arith.addf %90, %94 : vector<8x256xf32>
    %96 = vector.extract_strided_slice %0 {offsets = [24, 0], sizes = [8, 1], strides = [1, 1]} : vector<168x1xf32> to vector<8x1xf32>
    %97 = vector.extract_strided_slice %0 {offsets = [56, 0], sizes = [8, 1], strides = [1, 1]} : vector<168x1xf32> to vector<8x1xf32>
    %cst_30 = arith.constant dense<0.000000e+00> : vector<8x1xf32>
    %98 = tpu.matmul %95, %1, %cst_30 {dimension_numbers = #tpu.dot_dimension_numbers<[1], [0], [0], [1], [0, 0, 1, 1], [], []>} : vector<8x256xf32>, vector<256x1xf32>, vector<8x1xf32> -> vector<8x1xf32>
    %99 = arith.mulf %95, %95 : vector<8x256xf32>
    %cst_31 = arith.constant dense<0.000000e+00> : vector<8x1xf32>
    %100 = tpu.matmul %99, %1, %cst_31 {dimension_numbers = #tpu.dot_dimension_numbers<[1], [0], [0], [1], [0, 0, 1, 1], [], []>} : vector<8x256xf32>, vector<256x1xf32>, vector<8x1xf32> -> vector<8x1xf32>
    %101 = arith.mulf %98, %98 : vector<8x1xf32>
    %102 = arith.subf %100, %101 : vector<8x1xf32>
    %cst_32 = arith.constant 9.99999974E-6 : f32
    %103 = vector.broadcast %cst_32 : f32 to vector<8x1xf32>
    %104 = arith.addf %102, %103 : vector<8x1xf32>
    %105 = math.rsqrt %104 : vector<8x1xf32>
    %106 = arith.mulf %96, %105 : vector<8x1xf32>
    %107 = arith.mulf %98, %106 : vector<8x1xf32>
    %108 = arith.subf %97, %107 : vector<8x1xf32>
    %109 = vector.broadcast %106 : vector<8x1xf32> to vector<8x256xf32>
    %110 = arith.mulf %95, %109 : vector<8x256xf32>
    %111 = vector.broadcast %108 : vector<8x1xf32> to vector<8x256xf32>
    %112 = arith.addf %110, %111 : vector<8x256xf32>
    %113 = arith.negf %112 : vector<8x256xf32>
    %114 = math.exp %113 : vector<8x256xf32>
    %cst_33 = arith.constant 1.000000e+00 : f32
    %115 = vector.broadcast %cst_33 : f32 to vector<8x256xf32>
    %116 = arith.addf %115, %114 : vector<8x256xf32>
    %117 = arith.divf %115, %116 : vector<8x256xf32>
    %118 = arith.mulf %112, %117 : vector<8x256xf32>
    %c241_i32_34 = arith.constant 241 : i32
    %119 = tpu.dynamic_rotate %118 by %c241_i32_34 dim 1 : vector<8x256xf32>, i32 -> vector<8x256xf32>
    %c1_i32_35 = arith.constant 1 : i32
    %120 = tpu.dynamic_rotate %118 by %c1_i32_35 dim 1 : vector<8x256xf32>, i32 -> vector<8x256xf32>
    %121 = arith.select %44, %119, %120 : vector<8x256xi1>, vector<8x256xf32>
    %c15_i32_36 = arith.constant 15 : i32
    %122 = tpu.dynamic_rotate %118 by %c15_i32_36 dim 1 : vector<8x256xf32>, i32 -> vector<8x256xf32>
    %c255_i32_37 = arith.constant 255 : i32
    %123 = tpu.dynamic_rotate %118 by %c255_i32_37 dim 1 : vector<8x256xf32>, i32 -> vector<8x256xf32>
    %124 = arith.select %46, %122, %123 : vector<8x256xi1>, vector<8x256xf32>
    %125 = tpu.concatenate %121, %118, %124 in 0 : vector<8x256xf32>, vector<8x256xf32>, vector<8x256xf32> -> vector<24x256xf32>
    %c16_i32_38 = arith.constant 16 : i32
    %126 = tpu.dynamic_rotate %125 by %c16_i32_38 dim 1 : vector<24x256xf32>, i32 -> vector<24x256xf32>
    %c240_i32_39 = arith.constant 240 : i32
    %127 = tpu.dynamic_rotate %125 by %c240_i32_39 dim 1 : vector<24x256xf32>, i32 -> vector<24x256xf32>
    %128 = vector.extract_strided_slice %47 {offsets = [3, 0, 0], sizes = [1, 8, 24], strides = [1, 1, 1]} : vector<12x8x24xf32> to vector<1x8x24xf32>
    %129 = vector.shape_cast %128 : vector<1x8x24xf32> to vector<8x24xf32>
    %cst_40 = arith.constant dense<0.000000e+00> : vector<8x256xf32>
    %130 = tpu.matmul %129, %126, %cst_40 {dimension_numbers = #tpu.dot_dimension_numbers<[1], [0], [0], [1], [0, 0, 1, 1], [], []>} : vector<8x24xf32>, vector<24x256xf32>, vector<8x256xf32> -> vector<8x256xf32>
    %131 = vector.extract_strided_slice %47 {offsets = [4, 0, 0], sizes = [1, 8, 24], strides = [1, 1, 1]} : vector<12x8x24xf32> to vector<1x8x24xf32>
    %132 = vector.shape_cast %131 : vector<1x8x24xf32> to vector<8x24xf32>
    %cst_41 = arith.constant dense<0.000000e+00> : vector<8x256xf32>
    %133 = tpu.matmul %132, %125, %cst_41 {dimension_numbers = #tpu.dot_dimension_numbers<[1], [0], [0], [1], [0, 0, 1, 1], [], []>} : vector<8x24xf32>, vector<24x256xf32>, vector<8x256xf32> -> vector<8x256xf32>
    %134 = arith.addf %130, %133 : vector<8x256xf32>
    %135 = vector.extract_strided_slice %47 {offsets = [5, 0, 0], sizes = [1, 8, 24], strides = [1, 1, 1]} : vector<12x8x24xf32> to vector<1x8x24xf32>
    %136 = vector.shape_cast %135 : vector<1x8x24xf32> to vector<8x24xf32>
    %cst_42 = arith.constant dense<0.000000e+00> : vector<8x256xf32>
    %137 = tpu.matmul %136, %127, %cst_42 {dimension_numbers = #tpu.dot_dimension_numbers<[1], [0], [0], [1], [0, 0, 1, 1], [], []>} : vector<8x24xf32>, vector<24x256xf32>, vector<8x256xf32> -> vector<8x256xf32>
    %138 = arith.addf %134, %137 : vector<8x256xf32>
    %139 = vector.extract_strided_slice %0 {offsets = [88, 0], sizes = [8, 1], strides = [1, 1]} : vector<168x1xf32> to vector<8x1xf32>
    %140 = vector.broadcast %139 : vector<8x1xf32> to vector<8x256xf32>
    %141 = arith.addf %138, %140 : vector<8x256xf32>
    %142 = arith.addf %37, %141 : vector<8x256xf32>
    %cst_43 = arith.constant 0.707106769 : f32
    %143 = vector.broadcast %cst_43 : f32 to vector<8x256xf32>
    %144 = arith.mulf %142, %143 : vector<8x256xf32>
    %145 = vector.extract_strided_slice %0 {offsets = [32, 0], sizes = [8, 1], strides = [1, 1]} : vector<168x1xf32> to vector<8x1xf32>
    %146 = vector.extract_strided_slice %0 {offsets = [64, 0], sizes = [8, 1], strides = [1, 1]} : vector<168x1xf32> to vector<8x1xf32>
    %cst_44 = arith.constant dense<0.000000e+00> : vector<8x1xf32>
    %147 = tpu.matmul %144, %1, %cst_44 {dimension_numbers = #tpu.dot_dimension_numbers<[1], [0], [0], [1], [0, 0, 1, 1], [], []>} : vector<8x256xf32>, vector<256x1xf32>, vector<8x1xf32> -> vector<8x1xf32>
    %148 = arith.mulf %144, %144 : vector<8x256xf32>
    %cst_45 = arith.constant dense<0.000000e+00> : vector<8x1xf32>
    %149 = tpu.matmul %148, %1, %cst_45 {dimension_numbers = #tpu.dot_dimension_numbers<[1], [0], [0], [1], [0, 0, 1, 1], [], []>} : vector<8x256xf32>, vector<256x1xf32>, vector<8x1xf32> -> vector<8x1xf32>
    %150 = arith.mulf %147, %147 : vector<8x1xf32>
    %151 = arith.subf %149, %150 : vector<8x1xf32>
    %cst_46 = arith.constant 9.99999974E-6 : f32
    %152 = vector.broadcast %cst_46 : f32 to vector<8x1xf32>
    %153 = arith.addf %151, %152 : vector<8x1xf32>
    %154 = math.rsqrt %153 : vector<8x1xf32>
    %155 = arith.mulf %145, %154 : vector<8x1xf32>
    %156 = arith.mulf %147, %155 : vector<8x1xf32>
    %157 = arith.subf %146, %156 : vector<8x1xf32>
    %158 = vector.broadcast %155 : vector<8x1xf32> to vector<8x256xf32>
    %159 = arith.mulf %144, %158 : vector<8x256xf32>
    %160 = vector.broadcast %157 : vector<8x1xf32> to vector<8x256xf32>
    %161 = arith.addf %159, %160 : vector<8x256xf32>
    %162 = arith.negf %161 : vector<8x256xf32>
    %163 = math.exp %162 : vector<8x256xf32>
    %cst_47 = arith.constant 1.000000e+00 : f32
    %164 = vector.broadcast %cst_47 : f32 to vector<8x256xf32>
    %165 = arith.addf %164, %163 : vector<8x256xf32>
    %166 = arith.divf %164, %165 : vector<8x256xf32>
    %167 = arith.mulf %161, %166 : vector<8x256xf32>
    %c241_i32_48 = arith.constant 241 : i32
    %168 = tpu.dynamic_rotate %167 by %c241_i32_48 dim 1 : vector<8x256xf32>, i32 -> vector<8x256xf32>
    %c1_i32_49 = arith.constant 1 : i32
    %169 = tpu.dynamic_rotate %167 by %c1_i32_49 dim 1 : vector<8x256xf32>, i32 -> vector<8x256xf32>
    %170 = arith.select %44, %168, %169 : vector<8x256xi1>, vector<8x256xf32>
    %c15_i32_50 = arith.constant 15 : i32
    %171 = tpu.dynamic_rotate %167 by %c15_i32_50 dim 1 : vector<8x256xf32>, i32 -> vector<8x256xf32>
    %c255_i32_51 = arith.constant 255 : i32
    %172 = tpu.dynamic_rotate %167 by %c255_i32_51 dim 1 : vector<8x256xf32>, i32 -> vector<8x256xf32>
    %173 = arith.select %46, %171, %172 : vector<8x256xi1>, vector<8x256xf32>
    %174 = tpu.concatenate %170, %167, %173 in 0 : vector<8x256xf32>, vector<8x256xf32>, vector<8x256xf32> -> vector<24x256xf32>
    %c16_i32_52 = arith.constant 16 : i32
    %175 = tpu.dynamic_rotate %174 by %c16_i32_52 dim 1 : vector<24x256xf32>, i32 -> vector<24x256xf32>
    %c240_i32_53 = arith.constant 240 : i32
    %176 = tpu.dynamic_rotate %174 by %c240_i32_53 dim 1 : vector<24x256xf32>, i32 -> vector<24x256xf32>
    %177 = vector.extract_strided_slice %47 {offsets = [6, 0, 0], sizes = [1, 8, 24], strides = [1, 1, 1]} : vector<12x8x24xf32> to vector<1x8x24xf32>
    %178 = vector.shape_cast %177 : vector<1x8x24xf32> to vector<8x24xf32>
    %cst_54 = arith.constant dense<0.000000e+00> : vector<8x256xf32>
    %179 = tpu.matmul %178, %175, %cst_54 {dimension_numbers = #tpu.dot_dimension_numbers<[1], [0], [0], [1], [0, 0, 1, 1], [], []>} : vector<8x24xf32>, vector<24x256xf32>, vector<8x256xf32> -> vector<8x256xf32>
    %180 = vector.extract_strided_slice %47 {offsets = [7, 0, 0], sizes = [1, 8, 24], strides = [1, 1, 1]} : vector<12x8x24xf32> to vector<1x8x24xf32>
    %181 = vector.shape_cast %180 : vector<1x8x24xf32> to vector<8x24xf32>
    %cst_55 = arith.constant dense<0.000000e+00> : vector<8x256xf32>
    %182 = tpu.matmul %181, %174, %cst_55 {dimension_numbers = #tpu.dot_dimension_numbers<[1], [0], [0], [1], [0, 0, 1, 1], [], []>} : vector<8x24xf32>, vector<24x256xf32>, vector<8x256xf32> -> vector<8x256xf32>
    %183 = arith.addf %179, %182 : vector<8x256xf32>
    %184 = vector.extract_strided_slice %47 {offsets = [8, 0, 0], sizes = [1, 8, 24], strides = [1, 1, 1]} : vector<12x8x24xf32> to vector<1x8x24xf32>
    %185 = vector.shape_cast %184 : vector<1x8x24xf32> to vector<8x24xf32>
    %cst_56 = arith.constant dense<0.000000e+00> : vector<8x256xf32>
    %186 = tpu.matmul %185, %176, %cst_56 {dimension_numbers = #tpu.dot_dimension_numbers<[1], [0], [0], [1], [0, 0, 1, 1], [], []>} : vector<8x24xf32>, vector<24x256xf32>, vector<8x256xf32> -> vector<8x256xf32>
    %187 = arith.addf %183, %186 : vector<8x256xf32>
    %188 = vector.extract_strided_slice %0 {offsets = [96, 0], sizes = [8, 1], strides = [1, 1]} : vector<168x1xf32> to vector<8x1xf32>
    %189 = vector.extract_strided_slice %13 {offsets = [8, 0], sizes = [8, 1], strides = [1, 1]} : vector<16x1xf32> to vector<8x1xf32>
    %190 = arith.addf %188, %189 : vector<8x1xf32>
    %191 = vector.broadcast %190 : vector<8x1xf32> to vector<8x256xf32>
    %192 = arith.addf %187, %191 : vector<8x256xf32>
    %193 = vector.extract_strided_slice %0 {offsets = [40, 0], sizes = [8, 1], strides = [1, 1]} : vector<168x1xf32> to vector<8x1xf32>
    %194 = vector.extract_strided_slice %0 {offsets = [72, 0], sizes = [8, 1], strides = [1, 1]} : vector<168x1xf32> to vector<8x1xf32>
    %cst_57 = arith.constant dense<0.000000e+00> : vector<8x1xf32>
    %195 = tpu.matmul %192, %1, %cst_57 {dimension_numbers = #tpu.dot_dimension_numbers<[1], [0], [0], [1], [0, 0, 1, 1], [], []>} : vector<8x256xf32>, vector<256x1xf32>, vector<8x1xf32> -> vector<8x1xf32>
    %196 = arith.mulf %192, %192 : vector<8x256xf32>
    %cst_58 = arith.constant dense<0.000000e+00> : vector<8x1xf32>
    %197 = tpu.matmul %196, %1, %cst_58 {dimension_numbers = #tpu.dot_dimension_numbers<[1], [0], [0], [1], [0, 0, 1, 1], [], []>} : vector<8x256xf32>, vector<256x1xf32>, vector<8x1xf32> -> vector<8x1xf32>
    %198 = arith.mulf %195, %195 : vector<8x1xf32>
    %199 = arith.subf %197, %198 : vector<8x1xf32>
    %cst_59 = arith.constant 9.99999974E-6 : f32
    %200 = vector.broadcast %cst_59 : f32 to vector<8x1xf32>
    %201 = arith.addf %199, %200 : vector<8x1xf32>
    %202 = math.rsqrt %201 : vector<8x1xf32>
    %203 = arith.mulf %193, %202 : vector<8x1xf32>
    %204 = arith.mulf %195, %203 : vector<8x1xf32>
    %205 = arith.subf %194, %204 : vector<8x1xf32>
    %206 = vector.broadcast %203 : vector<8x1xf32> to vector<8x256xf32>
    %207 = arith.mulf %192, %206 : vector<8x256xf32>
    %208 = vector.broadcast %205 : vector<8x1xf32> to vector<8x256xf32>
    %209 = arith.addf %207, %208 : vector<8x256xf32>
    %210 = arith.negf %209 : vector<8x256xf32>
    %211 = math.exp %210 : vector<8x256xf32>
    %cst_60 = arith.constant 1.000000e+00 : f32
    %212 = vector.broadcast %cst_60 : f32 to vector<8x256xf32>
    %213 = arith.addf %212, %211 : vector<8x256xf32>
    %214 = arith.divf %212, %213 : vector<8x256xf32>
    %215 = arith.mulf %209, %214 : vector<8x256xf32>
    %c241_i32_61 = arith.constant 241 : i32
    %216 = tpu.dynamic_rotate %215 by %c241_i32_61 dim 1 : vector<8x256xf32>, i32 -> vector<8x256xf32>
    %c1_i32_62 = arith.constant 1 : i32
    %217 = tpu.dynamic_rotate %215 by %c1_i32_62 dim 1 : vector<8x256xf32>, i32 -> vector<8x256xf32>
    %218 = arith.select %44, %216, %217 : vector<8x256xi1>, vector<8x256xf32>
    %c15_i32_63 = arith.constant 15 : i32
    %219 = tpu.dynamic_rotate %215 by %c15_i32_63 dim 1 : vector<8x256xf32>, i32 -> vector<8x256xf32>
    %c255_i32_64 = arith.constant 255 : i32
    %220 = tpu.dynamic_rotate %215 by %c255_i32_64 dim 1 : vector<8x256xf32>, i32 -> vector<8x256xf32>
    %221 = arith.select %46, %219, %220 : vector<8x256xi1>, vector<8x256xf32>
    %222 = tpu.concatenate %218, %215, %221 in 0 : vector<8x256xf32>, vector<8x256xf32>, vector<8x256xf32> -> vector<24x256xf32>
    %c16_i32_65 = arith.constant 16 : i32
    %223 = tpu.dynamic_rotate %222 by %c16_i32_65 dim 1 : vector<24x256xf32>, i32 -> vector<24x256xf32>
    %c240_i32_66 = arith.constant 240 : i32
    %224 = tpu.dynamic_rotate %222 by %c240_i32_66 dim 1 : vector<24x256xf32>, i32 -> vector<24x256xf32>
    %225 = vector.extract_strided_slice %47 {offsets = [9, 0, 0], sizes = [1, 8, 24], strides = [1, 1, 1]} : vector<12x8x24xf32> to vector<1x8x24xf32>
    %226 = vector.shape_cast %225 : vector<1x8x24xf32> to vector<8x24xf32>
    %cst_67 = arith.constant dense<0.000000e+00> : vector<8x256xf32>
    %227 = tpu.matmul %226, %223, %cst_67 {dimension_numbers = #tpu.dot_dimension_numbers<[1], [0], [0], [1], [0, 0, 1, 1], [], []>} : vector<8x24xf32>, vector<24x256xf32>, vector<8x256xf32> -> vector<8x256xf32>
    %228 = vector.extract_strided_slice %47 {offsets = [10, 0, 0], sizes = [1, 8, 24], strides = [1, 1, 1]} : vector<12x8x24xf32> to vector<1x8x24xf32>
    %229 = vector.shape_cast %228 : vector<1x8x24xf32> to vector<8x24xf32>
    %cst_68 = arith.constant dense<0.000000e+00> : vector<8x256xf32>
    %230 = tpu.matmul %229, %222, %cst_68 {dimension_numbers = #tpu.dot_dimension_numbers<[1], [0], [0], [1], [0, 0, 1, 1], [], []>} : vector<8x24xf32>, vector<24x256xf32>, vector<8x256xf32> -> vector<8x256xf32>
    %231 = arith.addf %227, %230 : vector<8x256xf32>
    %232 = vector.extract_strided_slice %47 {offsets = [11, 0, 0], sizes = [1, 8, 24], strides = [1, 1, 1]} : vector<12x8x24xf32> to vector<1x8x24xf32>
    %233 = vector.shape_cast %232 : vector<1x8x24xf32> to vector<8x24xf32>
    %cst_69 = arith.constant dense<0.000000e+00> : vector<8x256xf32>
    %234 = tpu.matmul %233, %224, %cst_69 {dimension_numbers = #tpu.dot_dimension_numbers<[1], [0], [0], [1], [0, 0, 1, 1], [], []>} : vector<8x24xf32>, vector<24x256xf32>, vector<8x256xf32> -> vector<8x256xf32>
    %235 = arith.addf %231, %234 : vector<8x256xf32>
    %236 = vector.extract_strided_slice %0 {offsets = [104, 0], sizes = [8, 1], strides = [1, 1]} : vector<168x1xf32> to vector<8x1xf32>
    %237 = vector.broadcast %236 : vector<8x1xf32> to vector<8x256xf32>
    %238 = arith.addf %235, %237 : vector<8x256xf32>
    %239 = arith.addf %144, %238 : vector<8x256xf32>
    %cst_70 = arith.constant 0.707106769 : f32
    %240 = vector.broadcast %cst_70 : f32 to vector<8x256xf32>
    %241 = arith.mulf %239, %240 : vector<8x256xf32>
    %cst_71 = arith.constant dense<0.000000e+00> : vector<8x1xf32>
    %242 = tpu.matmul %241, %1, %cst_71 {dimension_numbers = #tpu.dot_dimension_numbers<[1], [0], [0], [1], [0, 0, 1, 1], [], []>} : vector<8x256xf32>, vector<256x1xf32>, vector<8x1xf32> -> vector<8x1xf32>
    %c0_72 = arith.constant 0 : index
    %c0_73 = arith.constant 0 : index
    %243 = vector.load %arg7[%c0_72, %c0_73] : memref<9x8xf32, #tpu.memory_space<vmem>>, vector<9x8xf32>
    %cst_74 = arith.constant dense<0.000000e+00> : vector<9x1xf32>
    %244 = tpu.matmul %243, %242, %cst_74 {dimension_numbers = #tpu.dot_dimension_numbers<[1], [0], [0], [1], [0, 0, 1, 1], [], []>} : vector<9x8xf32>, vector<8x1xf32>, vector<9x1xf32> -> vector<9x1xf32>
    %245 = vector.extract_strided_slice %0 {offsets = [128, 0], sizes = [9, 1], strides = [1, 1]} : vector<168x1xf32> to vector<9x1xf32>
    %246 = arith.addf %244, %245 : vector<9x1xf32>
    %c0_75 = arith.constant 0 : index
    %c0_76 = arith.constant 0 : index
    %c0_77 = arith.constant 0 : index
    %247 = vector.load %arg9[%c0_75, %c0_76, %c0_77] : memref<1x9x1xf32, #tpu.memory_space<vmem>>, vector<1x9x1xf32>
    %248 = vector.shape_cast %247 : vector<1x9x1xf32> to vector<9x1xf32>
    %249 = vector.shape_cast %246 : vector<9x1xf32> to vector<1x9x1xf32>
    tpu.vector_store %arg9[%c0_75, %c0_76, %c0_77], %249 {strides = array<i32>} : memref<1x9x1xf32, #tpu.memory_space<vmem>>, vector<1x9x1xf32>,
    return
  }
  func.func @transform_0(%arg0: i32) -> (i32, i32, i32) {
    %c0_i32 = arith.constant 0 : i32
    %c0_i32_0 = arith.constant 0 : i32
    %c0_i32_1 = arith.constant 0 : i32
    return %arg0, %c0_i32, %c0_i32_0 : i32, i32, i32
  }
  func.func @transform_1(%arg0: i32) -> (i32, i32, i32) {
    %c0_i32 = arith.constant 0 : i32
    %c0_i32_0 = arith.constant 0 : i32
    %c0_i32_1 = arith.constant 0 : i32
    return %arg0, %c0_i32, %c0_i32_0 : i32, i32, i32
  }
  func.func @transform_2(%arg0: i32) -> (i32, i32) {
    %c0_i32 = arith.constant 0 : i32
    %c0_i32_0 = arith.constant 0 : i32
    %c0_i32_1 = arith.constant 0 : i32
    return %c0_i32, %c0_i32_0 : i32, i32
  }
  func.func @transform_3(%arg0: i32) -> (i32, i32) {
    %c0_i32 = arith.constant 0 : i32
    %c0_i32_0 = arith.constant 0 : i32
    %c0_i32_1 = arith.constant 0 : i32
    return %c0_i32, %c0_i32_0 : i32, i32
  }
  func.func @transform_4(%arg0: i32) -> (i32, i32, i32) {
    %c0_i32 = arith.constant 0 : i32
    %c0_i32_0 = arith.constant 0 : i32
    %c0_i32_1 = arith.constant 0 : i32
    %c0_i32_2 = arith.constant 0 : i32
    return %c0_i32, %c0_i32_0, %c0_i32_1 : i32, i32, i32
  }
  func.func @transform_5(%arg0: i32) -> (i32, i32) {
    %c0_i32 = arith.constant 0 : i32
    %c0_i32_0 = arith.constant 0 : i32
    %c0_i32_1 = arith.constant 0 : i32
    return %c0_i32, %c0_i32_0 : i32, i32
  }
  func.func @transform_6(%arg0: i32) -> (i32, i32) {
    %c0_i32 = arith.constant 0 : i32
    %c0_i32_0 = arith.constant 0 : i32
    %c0_i32_1 = arith.constant 0 : i32
    return %c0_i32, %c0_i32_0 : i32, i32
  }
  func.func @transform_7(%arg0: i32) -> (i32, i32) {
    %c0_i32 = arith.constant 0 : i32
    %c0_i32_0 = arith.constant 0 : i32
    %c0_i32_1 = arith.constant 0 : i32
    return %c0_i32, %c0_i32_0 : i32, i32
  }
  func.func @transform_8(%arg0: i32) -> (i32, i32, i32) {
    %c0_i32 = arith.constant 0 : i32
    %c0_i32_0 = arith.constant 0 : i32
    %c0_i32_1 = arith.constant 0 : i32
    return %arg0, %c0_i32, %c0_i32_0 : i32, i32, i32
  }
}

</mosaic_0001>

<bundles_post_ra>
// kernel: tpu_custom_call.1
= control target key start
LH: loop header
LB: loop body
LE: loop exit
PB: predicated region body
PF: predicated region fallthrough
CT: control target
= control target key end

     0   :  { %s4462_s27 = smov 0   ;;  %s5334_s0 = inlined_call_operand.vmem [shape: f32[2,1,1], index: 0, kind: input, shape index: {}]   ;;  %s5335_s1 = inlined_call_operand.vmem [shape: f32[2,4,256], index: 1, kind: input, shape index: {}]   ;;  %s5336_s2 = inlined_call_operand.vmem [shape: f32[168,1], index: 2, kind: input, shape index: {}]   ;;  %s5337_s3 = inlined_call_operand.vmem [shape: f32[8,4], index: 3, kind: input, shape index: {}]   ;;  %s5338_s4 = inlined_call_operand.vmem [shape: f32[12,8,24], index: 4, kind: input, shape index: {}]   ;;  %s5339_s5 = inlined_call_operand.vmem [shape: f32[16,32], index: 5, kind: input, shape index: {}]   ;;  %s5340_s6 = inlined_call_operand.vmem [shape: f32[9,8], index: 6, kind: input, shape index: {}]   ;;  %s5341_s7 = inlined_call_operand.vmem [shape: f32[256,1], index: 7, kind: input, shape index: {}]   ;;  %s5342_s8 = inlined_call_operand.vmem [shape: f32[2,9,1], index: 8, kind: output, shape index: {}]  }
   0x1 LB: > { %s3299_s28 = sadd.s32 4294967295, %s4400_s27   ;;  %p3303_p0 = scmp.ge.s32.totalorder %s4400_s27, 1  ;;  %s4400_s27 = sphi %s4462_s27, %s18_s27  }
   0x2   : > { %p270_p1 = scmp.lt.s32.totalorder %s4400_s27, 3 }
   0x4   : > { %p271_p2 = pnand %p3303_p0, %p270_p1 }
   0x5   : > { %p307_p3 = scmp.lt.s32.totalorder (!%p271_p2), %s3299_s28, 1  ;;  %v357_v0 = vld [vmem:[%s5341_s7 + $0x80] sm:$0xff] (!%p271_p2)  ;;  %v321_v2 = vld [vmem:[%s5336_s2 + $0x8] sm:$0xff] (!%p271_p2)  ;;  %vm798_vm0 = vcmask (!%p271_p2), 261120   ;;  %v359_v9 = vld [vmem:[%s5341_s7 + $0x90] sm:$0xff] (!%p271_p2)  ;;  %s4411_s18 = smov (!%p271_p2), 1  }
   0x6   : > { %274 = sbr.rel (%p271_p2) target bundleno = 4660 (0x1234), region = 52  ;;  %v320_v1 = vld [vmem:[%s5336_s2] sm:$0xff] (!%p271_p2)  ;;  %v358_v3 = vld [vmem:[%s5341_s7 + $0x88] sm:$0xff] (!%p271_p2)  ;;  %v360_v10 = vld [vmem:[%s5341_s7 + $0x98] sm:$0xff] (!%p271_p2)  ;;  %s4412_s19 = smov (!%p271_p2), 113  }
   0x7   : > { %v4484_v4 = vpack.c.bf16 (!%p271_p2), %v358_v3, %v357_v0  ;;  %v341_v5 = vld [vmem:[%s5341_s7] sm:$0xff] (!%p271_p2)  ;;  %v342_v6 = vld [vmem:[%s5341_s7 + $0x8] sm:$0xff] (!%p271_p2)  ;;  %v4509_v12 = vpack.c.bf16 (!%p271_p2), %v360_v10, %v359_v9  ;;  %v343_v13 = vld [vmem:[%s5341_s7 + $0x10] sm:$0xff] (!%p271_p2)  ;;  %s4413_s20 = smov (!%p271_p2), 15   ;;  %s4414_s21 = smov (!%p271_p2), 127  }
   0x8   : > { %v796_v7 = vld [vmem:[%s5339_s5] sm:$0xff] (!%p271_p2)  ;;  %v4499_v8 = vpack.c.bf16 (!%p271_p2), %v342_v6, %v341_v5  ;;  %v344_v14 = vld [vmem:[%s5341_s7 + $0x18] sm:$0xff] (!%p271_p2)  ;;  %v362_v19 = vld [vmem:[%s5341_s7 + $0xa8] sm:$0xff] (!%p271_p2)  ;;  %s4415_s22 = smov (!%p271_p2), 16   ;;  %s4416_s25 = smov (!%p271_p2), 112  }
   0x9   : > { %3758 = vmatprep.mubr.msk.f32.mxu0 (!%p271_p2), %vm798_vm0, %v796_v7  ;;  %3775 = vmatprep.subr.bf16.mxu1 (!%p271_p2), %v4484_v4  ;;  %v4522_v17 = vpack.c.bf16 (!%p271_p2), %v344_v14, %v343_v13  ;;  %v361_v18 = vld [vmem:[%s5341_s7 + $0xa0] sm:$0xff] (!%p271_p2)  ;;  %v346_v22 = vld [vmem:[%s5341_s7 + $0x28] sm:$0xff] (!%p271_p2)  ;;  %v363_v25 = vld [vmem:[%s5341_s7 + $0xb0] sm:$0xff] (!%p271_p2) }
   0xa   : > { %3777 = vmatpush3.bf16.msra.mxu1 (!%p271_p2), %v4499_v8  ;;  %v4531_v20 = vpack.c.bf16 (!%p271_p2), %v362_v19, %v361_v18  ;;  %v345_v21 = vld [vmem:[%s5341_s7 + $0x20] sm:$0xff] (!%p271_p2)  ;;  %v364_v26 = vld [vmem:[%s5341_s7 + $0xb8] sm:$0xff] (!%p271_p2)  ;;  %v347_v32 = vld [vmem:[%s5341_s7 + $0x30] sm:$0xff] (!%p271_p2) }
   0xb   : > { %3779 = vmatprep.subr.bf16.mxu1 (!%p271_p2), %v4509_v12  ;;  %v4552_v31 = vpack.c.bf16 (!%p271_p2), %v346_v22, %v345_v21  ;;  %v4561_v35 = vpack.c.bf16 (!%p271_p2), %v364_v26, %v363_v25  ;;  %v348_v36 = vld [vmem:[%s5341_s7 + $0x38] sm:$0xff] (!%p271_p2)  ;;  %v365_v37 = vld [vmem:[%s5341_s7 + $0xc0] sm:$0xff] (!%p271_p2)  ;;  %v366_v38 = vld [vmem:[%s5341_s7 + $0xc8] sm:$0xff] (!%p271_p2)  ;;  %v4402_v21 = vmov (!%p271_p2), 683565275  }
   0xc   : > { %v349_v41 = vld [vmem:[%s5341_s7 + $0x40] sm:$0xff] (!%p271_p2)  ;;  %v350_v42 = vld [vmem:[%s5341_s7 + $0x48] sm:$0xff] (!%p271_p2)  ;;  %v367_v43 = vld [vmem:[%s5341_s7 + $0xd0] sm:$0xff] (!%p271_p2)  ;;  %v4594_v50 = vpack.c.bf16 (!%p271_p2), %v348_v36, %v347_v32  ;;  %v4606_v55 = vpack.c.bf16 (!%p271_p2), %v366_v38, %v365_v37  ;;  %v4404_v26 = vmov (!%p271_p2), 2131351028  }
   0xd   : > { %s5344_s28 = smov (!%p307_p3, %s3299_s28), 1  ;;  %v368_v45 = vld [vmem:[%s5341_s7 + $0xd8] sm:$0xff]  ;;  %v351_v46 = vld [vmem:[%s5341_s7 + $0x50] sm:$0xff]  ;;  %v369_v51 = vld [vmem:[%s5341_s7 + $0xe0] sm:$0xff]  ;;  %v4608_v56 = vpack.c.bf16 %v350_v42, %v349_v41  ;;  %v4406_v32 = vmov 920167782  }
   0xe   : > { %s309_s23 = scalar_lea.vmem %s5334_s0, %s5344_s28  ;;  %3781 = vmatpush3.bf16.msra.mxu1 %v4522_v17  ;;  %s3354_s26 = sshll.u32 %s5344_s28, 3  ;;  %v352_v47 = vld [vmem:[%s5341_s7 + $0x58] sm:$0xff]  ;;  %v370_v52 = vld [vmem:[%s5341_s7 + $0xe8] sm:$0xff]  ;;  %v353_v53 = vld [vmem:[%s5341_s7 + $0x60] sm:$0xff]  ;;  %v4621_v61 = vpack.c.bf16 %v368_v45, %v367_v43  ;;  %v4407_v41 = vmov 1326507024  }
   0xf   : > { %v3308_v11 = vld [vmem:[%s309_s23] ss:$0 sm:$0xff]  ;;  %3783 = vmatprep.subr.bf16.mxu1 %v4531_v20  ;;  %s314_s30 = scalar_lea.vmem %s5335_s1, %s3354_s26  ;;  %v354_v57 = vld [vmem:[%s5341_s7 + $0x68] sm:$0xff]  ;;  %v371_v58 = vld [vmem:[%s5341_s7 + $0xf0] sm:$0xff]  ;;  %v4623_v62 = vpack.c.bf16 %v352_v47, %v351_v46  ;;  %v4633_v3 = vpack.c.bf16 %v370_v52, %v369_v51  ;;  %s3355_s9 = sshll.u32 %s5344_s28, 4 }
  0x10   : > { %v4517_v15 = vmul.f32 %v3308_v11, %v320_v1  ;;  %v4519_v16 = vmul.f32 %v3308_v11, %v321_v2  ;;  %v372_v59 = vld [vmem:[%s5341_s7 + $0xf8] sm:$0xff]  ;;  %v355_v63 = vld [vmem:[%s5341_s7 + $0x70] sm:$0xff]  ;;  %v4631_v1 = vld [vmem:[%s314_s30] sm:$0xff]  ;;  %v4643_v13 = vpack.c.bf16 %v354_v57, %v353_v53  ;;  %s319_s15 = scalar_lea.vmem %s5342_s8, %s3355_s9 }
  0x11   : > { %v356_v0 = vld [vmem:[%s5341_s7 + $0x78] sm:$0xff]  ;;  %v882_v5 = vcombine.high %v4631_v1, %v4631_v1  ;;  %v4645_v14 = vpack.c.bf16 %v372_v59, %v371_v58 }
  0x12   : > { %v382_v23 = vand.u32 2147483647, %v4517_v15  ;;  %v385_v24 = vand.u32 2139095040, %v4517_v15  ;;  %v486_v27 = vand.u32 2147483647, %v4519_v16  ;;  %v489_v28 = vand.u32 2139095040, %v4519_v16  ;;  %3785 = vmatpush3.bf16.msra.mxu1 %v4552_v31 }
  0x13   : > { %3787 = vmatprep.subr.bf16.mxu1 %v4561_v35  ;;  %v4647_v18 = vpack.c.bf16 %v356_v0, %v355_v63  ;;  %948 = vmatprep.mubr.f32.mxu1 %v882_v5  ;;  %vm384_vm15 = vcmp.lt.s32.totalorder %v4517_v15, 0 }
  0x14   : > { %v386_v29 = vshrl.u32 %v385_v24, 23  ;;  %v389_v30 = vand.u32 8388607, %v382_v23  ;;  %v490_v33 = vshrl.u32 %v489_v28, 23  ;;  %v493_v34 = vand.u32 8388607, %v486_v27 }
  0x15   : > { %v4403_v24 = vmov 2475754826  }
  0x16   : > { %v3309_v39 = vadd.s32 4294967169, %v386_v29  ;;  %v390_v40 = vor.u32 8388608, %v389_v30  ;;  %v3313_v44 = vadd.s32 4294967169, %v490_v33  ;;  %v494_v49 = vor.u32 8388608, %v493_v34  ;;  %3789 = vmatpush3.bf16.msra.mxu1 %v4594_v50 }
  0x17   : > { %3791 = vmatprep.subr.bf16.mxu1 %v4606_v55  ;;  %v4405_v29 = vmov 2102212464  }
  0x18   : > { %v392_v48 = vadd.s32 1, %v3309_v39  ;;  %v496_v54 = vadd.s32 1, %v3313_v44  ;;  %v4619_v60 = vshll.u32 %v390_v40, 8  ;;  %v4637_v10 = vshll.u32 %v494_v49, 8 }
  0x1a   : > { %vm393_vm1 = vcmp.gt.s32.totalorder %v392_v48, 0  ;;  %vm497_vm2 = vcmp.gt.s32.totalorder %v496_v54, 0  ;;  %3793 = vmatpush3.bf16.msra.mxu1 %v4608_v56 }
  0x1b   : > { %v394_v2 = vsel %vm393_vm1, %v392_v48, 0  ;;  %v498_v9 = vsel %vm497_vm2, %v496_v54, 0  ;;  %3795 = vmatprep.subr.bf16.mxu1 %v4621_v61  ;;  %vm383_vm1 = vcmp.le.f32.partialorder %v382_v23, 0.7853982  ;;  %vm488_vm2 = vcmp.lt.s32.totalorder %v4519_v16, 0 }
  0x1c   : > { %v395_v6 = vshrl.u32 %v394_v2, 5  ;;  %v396_v7 = vand.u32 31, %v394_v2  ;;  %v4640_v11 = vand.u32 31, %v498_v9  ;;  %v4649_v34 = vshrl.u32 %v498_v9, 5 }
  0x1e   : > { %v397_v19 = vsub.s32 32, %v396_v7  ;;  %v399_v22 = vshll.u32 %v4402_v21, %v396_v7  ;;  %v402_v25 = vshll.u32 %v4403_v24, %v396_v7  ;;  %v405_v28 = vshll.u32 %v4404_v26, %v396_v7  ;;  %3797 = vmatpush3.bf16.msra.mxu1 %v4623_v62 }
  0x1f   : > { %v408_v30 = vshll.u32 %v4405_v29, %v396_v7  ;;  %v411_v33 = vshll.u32 %v4406_v32, %v396_v7  ;;  %vm414_vm3 = vcmp.lt.s32.totalorder %v395_v6, 1  ;;  %vm415_vm4 = vcmp.lt.s32.totalorder %v395_v6, 2  ;;  %3799 = vmatprep.subr.bf16.mxu1 %v4633_v3 }
  0x20   : > { %v398_v36 = vshrl.u32 %v4402_v21, %v397_v19  ;;  %v400_v37 = vshrl.u32 %v4403_v24, %v397_v19  ;;  %v403_v38 = vshrl.u32 %v4404_v26, %v397_v19  ;;  %v406_v39 = vshrl.u32 %v4405_v29, %v397_v19 }
  0x21   : > { %v409_v40 = vshrl.u32 %v4406_v32, %v397_v19  ;;  %v412_v42 = vshrl.u32 %v4407_v41, %v397_v19  ;;  %vm417_vm5 = vcmp.lt.s32.totalorder %v395_v6, 4  ;;  %v501_v46 = vsub.s32 32, %v4640_v11 }
  0x22   : > { %v401_v43 = vor.u32 %v400_v37, %v399_v22  ;;  %v404_v44 = vor.u32 %v403_v38, %v402_v25  ;;  %v407_v45 = vor.u32 %v406_v39, %v405_v28  ;;  %vm416_vm6 = vcmp.lt.s32.totalorder %v395_v6, 3  ;;  %3801 = vmatpush3.bf16.msra.mxu1 %v4643_v13 }
  0x23   : > { %v410_v47 = vor.u32 %v409_v40, %v408_v30  ;;  %v413_v48 = vor.u32 %v412_v42, %v411_v33  ;;  %v503_v49 = vshll.u32 %v4402_v21, %v4640_v11  ;;  %v506_v63 = vshll.u32 %v4403_v24, %v4640_v11  ;;  %3803 = vmatprep.subr.bf16.mxu1 %v4645_v14 }
  0x24   : > { %v418_v51 = vsel %vm414_vm3, %v398_v36, %v401_v43  ;;  %v419_v52 = vsel %vm417_vm5, %v407_v45, 2102212464  ;;  %v422_v53 = vsel %vm414_vm3, %v401_v43, %v404_v44  ;;  %v426_v54 = vsel %vm414_vm3, %v404_v44, %v407_v45 }
  0x25   : > { %v420_v57 = vsel %vm416_vm6, %v404_v44, %v419_v52  ;;  %v423_v58 = vsel %vm417_vm5, %v410_v47, 920167782  ;;  %v427_v59 = vsel %vm417_vm5, %v413_v48, 1326507024  ;;  %v502_v5 = vshrl.u32 %v4402_v21, %v501_v46 }
  0x26   : > { %v424_v0 = vsel %vm416_vm6, %v407_v45, %v423_v58  ;;  %v428_v2 = vsel %vm416_vm6, %v410_v47, %v427_v59  ;;  %v504_v7 = vshrl.u32 %v4403_v24, %v501_v46  ;;  %v421_v9 = vsel %vm415_vm4, %v418_v51, %v420_v57  ;;  %3805 = vmatpush3.bf16.msra.mxu1 %v4647_v18 }
  0x27   : > { %v425_v19 = vsel %vm415_vm4, %v422_v53, %v424_v0  ;;  %v429_v22 = vsel %vm415_vm4, %v426_v54, %v428_v2  ;;  %v507_v25 = vshrl.u32 %v4404_v26, %v501_v46  ;;  %v509_v24 = vshll.u32 %v4404_v26, %v4640_v11 }
  0x28   : > { %v4668_v28 = vmul.u32.u64.low %v4619_v60, %v429_v22  ;;  %v4669_v30 = vmul.u32.u64.high %v4619_v60, %v429_v22, %v4668_v28  ;;  %v4672_v33 = vmul.u32.u64.low %v4619_v60, %v425_v19  ;;  %v4673_v36 = vmul.u32.u64.high %v4619_v60, %v425_v19, %v4672_v33 }
  0x29   : > { %v505_v37 = vor.u32 %v504_v7, %v503_v49  ;;  %v508_v21 = vor.u32 %v507_v25, %v506_v63  ;;  %v510_v38 = vshrl.u32 %v4405_v29, %v501_v46  ;;  %v512_v6 = vshll.u32 %v4405_v29, %v4640_v11  ;;  %949 = vmatmul.mubr.f32.vlgmr.msra.gmra.mrb[0].mxu1 %v4631_v1 }
  0x2a   : > { %v513_v39 = vshrl.u32 %v4406_v32, %v501_v46  ;;  %v515_v40 = vshll.u32 %v4406_v32, %v4640_v11  ;;  %v516_v42 = vshrl.u32 %v4407_v41, %v501_v46  ;;  %v437_v43 = vmul.u32 %v4619_v60, %v421_v9 }
  0x2b   : > { %v511_v44 = vor.u32 %v510_v38, %v509_v24  ;;  %vm518_vm7 = vcmp.lt.s32.totalorder %v4649_v34, 1  ;;  %vm519_vm8 = vcmp.lt.s32.totalorder %v4649_v34, 2  ;;  %vm439_vm9 = vc.u32 %v4669_v30, %v4672_v33 }
  0x2c   : > { %v440_v26 = vadd.s32 1, %v4673_v36  ;;  %v514_v45 = vor.u32 %v513_v39, %v512_v6  ;;  %vm520_vm10 = vcmp.lt.s32.totalorder %v4649_v34, 3  ;;  %v517_v29 = vor.u32 %v516_v42, %v515_v40 }
  0x2d   : > { %vm521_vm11 = vcmp.lt.s32.totalorder %v4649_v34, 4  ;;  %v522_v11 = vsel %vm518_vm7, %v502_v5, %v505_v37  ;;  %v526_v32 = vsel %vm518_vm7, %v505_v37, %v508_v21  ;;  %v530_v47 = vsel %vm518_vm7, %v508_v21, %v511_v44 }
  0x2e   : > { %v441_v60 = vsel %vm439_vm9, %v440_v26, %v4673_v36  ;;  %v523_v41 = vsel %vm521_vm11, %v511_v44, 2102212464  ;;  %v527_v46 = vsel %vm521_vm11, %v514_v45, 920167782  ;;  %v531_v52 = vsel %vm521_vm11, %v517_v29, 1326507024 }
  0x2f   : > { %v442_v48 = vadd.s32 %v441_v60, %v437_v43  ;;  %v524_v49 = vsel %vm520_vm10, %v508_v21, %v523_v41  ;;  %v528_v51 = vsel %vm520_vm10, %v511_v44, %v527_v46  ;;  %v532_v57 = vsel %vm520_vm10, %v514_v45, %v531_v52 }
  0x30   : > { %v525_v53 = vsel %vm519_vm8, %v522_v11, %v524_v49  ;;  %v529_v54 = vsel %vm519_vm8, %v526_v32, %v528_v51  ;;  %v533_v59 = vsel %vm519_vm8, %v530_v47, %v532_v57  ;;  %v438_v42 = vadd.s32 %v4672_v33, %v4669_v30 }
  0x31   : > { %v443_v58 = vadd.s32 536870912, %v442_v48  ;;  %v4703_v63 = vmul.u32.u64.low %v4637_v10, %v529_v54  ;;  %v4704_v0 = vmul.u32.u64.high %v4637_v10, %v529_v54, %v4703_v63  ;;  %v541_v9 = vmul.u32 %v4637_v10, %v525_v53 }
  0x32   : > { %v4707_v2 = vmul.u32.u64.low %v4637_v10, %v533_v59  ;;  %v4708_v5 = vmul.u32.u64.high %v4637_v10, %v533_v59, %v4707_v2  ;;  %vm487_vm3 = vcmp.le.f32.partialorder %v486_v27, 0.7853982  ;;  %vm474_vm10 = vweird.f32 %v4517_v15 }
  0x33   : > { %v444_v7 = vshrl.u32 %v443_v58, 30  ;;  %v544_v22 = vadd.s32 1, %v4704_v0 }
  0x34   : > { %vm543_vm12 = vc.u32 %v4708_v5, %v4703_v63  ;;  %v542_v51 = vadd.s32 %v4703_v63, %v4708_v5 }
  0x35   : > { %v445_v19 = vshll.u32 %v444_v7, 30  ;;  %v545_v34 = vsel %vm543_vm12, %v544_v22, %v4704_v0  ;;  %v468_v2 = vsub.s32 4, %v444_v7 }
  0x36   : > { %v546_v28 = vadd.s32 %v545_v34, %v541_v9 }
  0x37   : > { %v446_v25 = vsub.s32 %v442_v48, %v445_v19  ;;  %v469_v34 = vsel %vm384_vm15, %v468_v2, %v444_v7 }
  0x38   : > { %v547_v37 = vadd.s32 536870912, %v546_v28 }
  0x39   : > { %v448_v36 = vsub.s32 0, %v446_v25 }
  0x3a   : > { %v548_v24 = vshrl.u32 %v547_v37, 30  ;;  %v471_v37 = vsel %vm383_vm1, 0, %v469_v34 }
  0x3b   : > { %v3310_v21 = vmin.u32 %v448_v36, %v446_v25 }
  0x3c   : > { %v549_v6 = vshll.u32 %v548_v24, 30  ;;  %v572_v36 = vsub.s32 4, %v548_v24 }
  0x3d   : > { %v450_v38 = vclz %v3310_v21 }
  0x3e   : > { %v550_v40 = vsub.s32 %v546_v28, %v549_v6  ;;  %v475_v6 = vadd.s32 3, %v471_v37 }
  0x3f   : > { %v3311_v39 = vadd.s32 4294967294, %v450_v38  ;;  %v573_v38 = vsel %vm488_vm2, %v572_v36, %v548_v24 }
  0x40   : > { %v552_v43 = vsub.s32 0, %v550_v40 }
  0x41   : > { %vm3312_vm13 = vcmp.lt.s32.totalorder %v3311_v39, 0 }
  0x42   : > { %v453_v10 = vsel %vm3312_vm13, 0, %v3311_v39  ;;  %v3314_v29 = vmin.u32 %v552_v43, %v550_v40  ;;  %v683_v43 = vand.u32 3, %v471_v37 }
  0x43   : > { %v454_v44 = vsub.s32 32, %v453_v10  ;;  %v455_v26 = vshll.u32 %v446_v25, %v453_v10  ;;  %v458_v45 = vsub.s32 4294967266, %v453_v10  ;;  %v476_v10 = vand.u32 3, %v475_v6 }
  0x44   : > { %v554_v60 = vclz %v3314_v29  ;;  %vm685_vm6 = vcmp.eq.s32.totalorder %v683_v43, 0  ;;  %vm688_vm7 = vcmp.eq.s32.totalorder %v683_v43, 2  ;;  %vm684_vm9 = vcmp.lt.s32.totalorder %v683_v43, 2  ;;  %v339_v43 = vld [vmem:[%s5336_s2 + $0x98] sm:$0xff] }
  0x45   : > { %v456_v11 = vshrl.u32 %v438_v42, %v454_v44  ;;  %v459_v32 = vadd.s32 127, %v458_v45  ;;  %v575_v42 = vsel %vm487_vm3, 0, %v573_v38  ;;  %vm478_vm4 = vcmp.eq.s32.totalorder %v476_v10, 0 }
  0x46   : > { %v3315_v47 = vadd.s32 4294967294, %v554_v60  ;;  %vm481_vm5 = vcmp.eq.s32.totalorder %v476_v10, 2  ;;  %v786_v24 = vand.u32 3, %v575_v42  ;;  %vm477_vm8 = vcmp.lt.s32.totalorder %v476_v10, 2 }
  0x47   : > { %v457_v41 = vor.u32 %v456_v11, %v455_v26  ;;  %v460_v46 = vshll.u32 %v459_v32, 23  ;;  %v579_v26 = vadd.s32 3, %v575_v42  ;;  %v338_v42 = vld [vmem:[%s5336_s2 + $0x90] sm:$0xff] }
  0x48   : > { %vm3316_vm14 = vcmp.lt.s32.totalorder %v3315_v47, 0  ;;  %vm788_vm12 = vcmp.eq.s32.totalorder %v786_v24, 0  ;;  %vm791_vm13 = vcmp.eq.s32.totalorder %v786_v24, 2 }
  0x49   : > { %v461_v48 = vor.u32 4788187, %v460_v46  ;;  %v464_v49 = vcvt.s32.f32 %v457_v41  ;;  %v557_v30 = vsel %vm3316_vm14, 0, %v3315_v47  ;;  %v580_v27 = vand.u32 3, %v579_v26 }
  0x4a   : > { %v558_v33 = vsub.s32 32, %v557_v30  ;;  %v559_v53 = vshll.u32 %v550_v40, %v557_v30  ;;  %v562_v54 = vsub.s32 4294967266, %v557_v30 }
  0x4b   : > { %v462_v52 = vand.u32 2147483647, %v461_v48  ;;  %vm585_vm11 = vcmp.eq.s32.totalorder %v580_v27, 2  ;;  %vm582_vm14 = vcmp.eq.s32.totalorder %v580_v27, 0 }
  0x4c   : > { %v560_v58 = vshrl.u32 %v542_v51, %v558_v33  ;;  %v563_v59 = vadd.s32 127, %v562_v54 }
  0x4d   : > { %v465_v57 = vmul.f32 %v464_v49, %v462_v52 }
  0x4e   : > { %v561_v9 = vor.u32 %v560_v58, %v559_v53  ;;  %v564_v19 = vshll.u32 %v563_v59, 23 }
  0x4f   : > { %v466_v0 = vxor.u32 2147483648, %v465_v57 }
  0x50   : > { %v565_v5 = vor.u32 4788187, %v564_v19  ;;  %v568_v25 = vcvt.s32.f32 %v561_v9 }
  0x51   : > { %v467_v22 = vsel %vm384_vm15, %v466_v0, %v465_v57  ;;  %vm581_vm15 = vcmp.lt.s32.totalorder %v580_v27, 2  ;;  %v4410_v27 = vmov 839922192  }
  0x52   : > { %v470_v63 = vsel %vm383_vm1, %v4517_v15, %v467_v22  ;;  %v566_v28 = vand.u32 2147483647, %v565_v5  ;;  %vm787_vm1 = vcmp.lt.s32.totalorder %v786_v24, 2  ;;  %v797_v15 = vld [vmem:[%s5339_s5 + $0x8] sm:$0xff]  ;;  %v4408_v5 = vmov 0  }
  0x53   : > { %4344 = vcosq.f32 %v470_v63  ;;  %4221 = vset.pattern.permute.xlu0 %v4408_v5  ;;  %4222 = vset.pattern.permute.xlu1 %v4408_v5  ;;  %v1040_v24 = vunpack.c.l.s4 %v4410_v27 }
  0x54   : > { %4346 = vsinq.f32 %v470_v63  ;;  %v569_v21 = vmul.f32 %v568_v25, %v566_v28 }
  0x56   : > { %v570_v23 = vxor.u32 2147483648, %v569_v21 }
  0x58   : > { %v571_v39 = vsel %vm488_vm2, %v570_v23, %v569_v21  ;;  %vm578_vm2 = vweird.f32 %v4519_v16 }
  0x59   : > { %v574_v40 = vsel %vm487_vm3, %v4519_v16, %v571_v39  ;;  %v954_v16 = vmul.f32 %v4631_v1, %v4631_v1  ;;  %vm1069_vm3 = vcmask 31744  }
  0x5a   : > { %4348 = vcosq.f32 %v574_v40 }
  0x5b   : > { %4350 = vsinq.f32 %v574_v40  ;;  %v956_v63 = vcombine.high %v954_v16, %v954_v16 }
  0x5d   : > { %v4345_v7 = vpop.eup %4344 }
  0x5e   : > { %v4347_v44 = vpop.eup %4346  ;;  %v482_v29 = vxor.u32 2147483648, %v4345_v7 }
  0x5f   : > { %v479_v45 = vxor.u32 2147483648, %v4347_v44 }
  0x60   : > { %v483_v32 = vsel %vm481_vm5, %v482_v29, %v4347_v44  ;;  %v690_v41 = vsel %vm688_vm7, %v482_v29, %v4347_v44  ;;  %v340_v29 = vld [vmem:[%s5336_s2 + $0xa0] sm:$0xff] }
  0x61   : > { %v480_v11 = vsel %vm478_vm4, %v4345_v7, %v479_v45  ;;  %v687_v60 = vsel %vm685_vm6, %v4345_v7, %v479_v45  ;;  %v4409_v45 = vmov 0.0   ;;  %1064 = vperm.xlu1 %4222, %v340_v29  }
  0x62   : > { %v484_v48 = vsel %vm477_vm8, %v480_v11, %v483_v32  ;;  %v691_v51 = vsel %vm684_vm9, %v687_v60, %v690_v41  ;;  %1142 = vmatprep.mubr.f32.mxu1 %v4409_v45  ;;  %v1042_v11 = vlaneseq  ;;  %v1041_v32 = vunpack.c.0.s8 %v1040_v24 }
  0x63   : > { %v485_v53 = vsel %vm474_vm10, nan, %v484_v48  ;;  %v692_v57 = vsel %vm474_vm10, nan, %v691_v51 }
  0x64   : > { %v4349_v46 = vpop.eup %4348  ;;  %v1043_v60 = vshrl.u32 %v1042_v11, 7 }
  0x65   : > { %v4351_v47 = vpop.eup %4350  ;;  %v586_v49 = vxor.u32 2147483648, %v4349_v46 }
  0x66   : > { %v583_v52 = vxor.u32 2147483648, %v4351_v47  ;;  %v1044_v41 = vsub.s32 %v1041_v32, %v1043_v60 }
  0x67   : > { %v587_v30 = vsel %vm585_vm11, %v586_v49, %v4351_v47  ;;  %v793_v33 = vsel %vm791_vm13, %v586_v49, %v4351_v47 }
  0x68   : > { %v584_v54 = vsel %vm582_vm14, %v4349_v46, %v583_v52  ;;  %v790_v58 = vsel %vm788_vm12, %v4349_v46, %v583_v52  ;;  %vm1419_vm12 = vcmask 195584  }
  0x69   : > { %v588_v59 = vsel %vm581_vm15, %v584_v54, %v587_v30  ;;  %v794_v0 = vsel %vm787_vm1, %v790_v58, %v793_v33  ;;  %v1061_v33 = vld [vmem:[%s5337_s3] sm:$0xff]  ;;  %vm3149_vm15 = vcmask 64512   ;;  %vm3233_vm1 = vcmask 0  }
  0x6a   : > { %v589_v2 = vsel %vm578_vm2, nan, %v588_v59  ;;  %v795_v9 = vsel %vm578_vm2, nan, %v794_v0  ;;  %vm3231_vm2 = vcmask 7168  }
  0x6b   : > { %v3766_v19 = vpack.c.bf16 %v589_v2, %v485_v53  ;;  %v3770_v22 = vpack.c.bf16 %v795_v9, %v692_v57 }
  0x6d   : > { %3767 = vmatprep.subr.bf16.mxu0 %v3766_v19 }
  0x6e   : > { %3769 = vmatpush3.bf16.msra.mxu0 %v3766_v19 }
  0x6f   : > { %3771 = vmatprep.subr.bf16.mxu0 %v3770_v22 }
  0x72   : > { %3773 = vmatpush3.bf16.msra.mxu0 %v3770_v22 }
  0x73   : > { %3807 = vmatprep.subr.bf16.mxu0 %v4484_v4 }
  0x75   : > { %3759 = vmatmul.mubr.msk.f32.vlgmr.msra.gmra.mrb[0].mxu0 %vm798_vm0, %v797_v15  ;;  %vm1073_vm0 = vcmask 1043456  }
  0x76   : > { %3809 = vmatpush3.bf16.msra.mxu0 %v4499_v8  ;;  %1022 = vmatprep.mubr.f32.mxu0 %v956_v63 }
  0x77   : > { %3811 = vmatprep.subr.bf16.mxu0 %v4509_v12 }
  0x7a   : > { %3813 = vmatpush3.bf16.msra.mxu0 %v4522_v17 }
  0x7b   : > { %3815 = vmatprep.subr.bf16.mxu0 %v4531_v20 }
  0x7e   : > { %3817 = vmatpush3.bf16.msra.mxu0 %v4552_v31 }
  0x7f   : > { %3819 = vmatprep.subr.bf16.mxu0 %v4561_v35 }
  0x82   : > { %3821 = vmatpush3.bf16.msra.mxu0 %v4594_v50 }
  0x83   : > { %3823 = vmatprep.subr.bf16.mxu0 %v4606_v55 }
  0x86   : > { %3825 = vmatpush3.bf16.msra.mxu0 %v4608_v56 }
  0x87   : > { %3827 = vmatprep.subr.bf16.mxu0 %v4621_v61 }
  0x8a   : > { %3829 = vmatpush3.bf16.msra.mxu0 %v4623_v62 }
  0x8b   : > { %3831 = vmatprep.subr.bf16.mxu0 %v4633_v3 }
  0x8e   : > { %3833 = vmatpush3.bf16.msra.mxu0 %v4643_v13 }
  0x8f   : > { %3835 = vmatprep.subr.bf16.mxu0 %v4645_v14 }
  0x92   : > { %3837 = vmatpush3.bf16.msra.mxu0 %v4647_v18 }
  0x93   : > { %3871 = vmatprep.subr.bf16.mxu0 %v4484_v4 }
  0x95   : > { %1023 = vmatmul.mubr.f32.vlgmr.msra.gmra.mrb[2].mxu0 %v954_v16 }
  0x96   : > { %3873 = vmatpush3.bf16.msra.mxu0 %v4499_v8 }
  0x97   : > { %3875 = vmatprep.subr.bf16.mxu0 %v4509_v12 }
  0x9a   : > { %3877 = vmatpush3.bf16.msra.mxu0 %v4522_v17 }
  0x9b   : > { %3879 = vmatprep.subr.bf16.mxu0 %v4531_v20 }
  0x9e   : > { %3881 = vmatpush3.bf16.msra.mxu0 %v4552_v31 }
  0x9f   : > { %3883 = vmatprep.subr.bf16.mxu0 %v4561_v35 }
  0xa2   : > { %3885 = vmatpush3.bf16.msra.mxu0 %v4594_v50 }
  0xa3   : > { %3887 = vmatprep.subr.bf16.mxu0 %v4606_v55 }
  0xa6   : > { %3889 = vmatpush3.bf16.msra.mxu0 %v4608_v56 }
  0xa7   : > { %3891 = vmatprep.subr.bf16.mxu0 %v4621_v61 }
  0xaa   : > { %3893 = vmatpush3.bf16.msra.mxu0 %v4623_v62 }
  0xab   : > { %3895 = vmatprep.subr.bf16.mxu0 %v4633_v3 }
  0xae   : > { %3897 = vmatpush3.bf16.msra.mxu0 %v4643_v13 }
  0xaf   : > { %3899 = vmatprep.subr.bf16.mxu0 %v4645_v14 }
  0xb2   : > { %3901 = vmatpush3.bf16.msra.mxu0 %v4647_v18 }
  0xfc   : > { %v3394_v25 = vpop.f32.mrb[0].mxu1 }
  0xfd   : > { %v3395_v34 = vpop.f32.mrb[1].mxu1 }
  0xfe   : > { %v3396_v28 = vadd.f32 %v3395_v34, %v3394_v25  ;;  %v322_v34 = vld [vmem:[%s5336_s2 + $0x10] sm:$0xff] }
 0x100   : > { %v1028_v21 = vmul.f32 %v3396_v28, %v3396_v28 }
 0x148   : > { %v4769_v36 = vpop.f32.mrb[0].mxu0 }
 0x149   : > { %v4771_v37 = vpop.f32.mrb[1].mxu0 }
 0x168   : > { %v3429_v23 = vpop.f32.mrb[2].mxu0 }
 0x169   : > { %v3430_v38 = vpop.f32.mrb[3].mxu0 }
 0x16a   : > { %v3431_v6 = vadd.f32 %v3430_v38, %v3429_v23  ;;  %v326_v23 = vld [vmem:[%s5336_s2 + $0x30] sm:$0xff] }
 0x16c   : > { %v1029_v39 = vsub.f32 %v3431_v6, %v1028_v21 }
 0x16e   : > { %v1030_v40 = vadd.f32 1e-05, %v1029_v39 }
 0x170   : > { %4352 = vrsqrt.f32 %v1030_v40 }
 0x17a   : > { %v4353_v7 = vpop.eup %4352 }
 0x17b   : > { %v1032_v10 = vmul.f32 %v4353_v7, %v338_v42 }
 0x17d   : > { %1037 = vperm.xlu0 %4221, %v1032_v10   ;;  %v1033_v44 = vmul.f32 %v3396_v28, %v1032_v10 }
 0x17f   : > { %v1034_v26 = vsub.f32 %v339_v43, %v1033_v44 }
 0x181   : > { %1050 = vperm.xlu0 %4221, %v1034_v26  }
 0x1fc   : > { %v1038_v46 = vpop.permute.xlu0 %1037 }
 0x1fd   : > { %v1045_v47 = vrot.slane %v1038_v46, %v1044_v41 }
 0x1ff   : > { %v1047_v49 = vmul.f32 %v1045_v47, %v4631_v1  ;;  %v1065_v1 = vpop.permute.xlu1 %1064 }
 0x200   : > { %v1051_v48 = vpop.permute.xlu0 %1050 }
 0x201   : > { %v1058_v51 = vrot.slane %v1051_v48, %v1044_v41 }
 0x203   : > { %v1060_v52 = vadd.f32 %v1058_v51, %v1047_v49  ;;  %v4831_v49 = vand.u32 127, %v1042_v11 }
 0x205   : > { %v1068_v30 = vcombine.high %v1060_v52, %v1060_v52  ;;  %v1151_v51 = vadd.s32 128, %v4831_v49  ;;  %vm1360_vm4 = vcmp.lt.s32.totalorder %v4831_v49, 1  ;;  %vm1353_vm5 = vcmp.lt.s32.totalorder %v4831_v49, 113 }
 0x206   : > { %vm1369_vm8 = vcmp.lt.s32.totalorder %v4831_v49, 15  ;;  %vm1376_vm9 = vcmp.lt.s32.totalorder %v4831_v49, 127  ;;  %vm1393_vm13 = vcmp.lt.s32.totalorder %v4831_v49, 16  ;;  %vm1412_vm14 = vcmp.lt.s32.totalorder %v4831_v49, 112 }
 0x207   : > { %3327 = vmatprep.subr.msk.mxu1 %vm1073_vm0, %v1068_v30  ;;  %v1152_v30 = vand.u32 255, %v4831_v49  ;;  %v3147_v49 = vld [vmem:[%s5340_s6] sm:$0xff] }
 0x208   : > { %3328 = vmatpush1.msk.msra.mxu1 %vm1073_vm0, %v1060_v52  ;;  %v1153_v52 = vand.u32 255, %v1151_v51 }
 0x209   : > { %3329 = vmatmul.mubr.msk.f32.vlgmr.msra.gmra.mrb[2].mxu1 %vm1069_vm3, %v1061_v33  ;;  %3839 = vmatprep.subr.bf16.mxu1 %v4484_v4 }
 0x20a   : > { %3841 = vmatpush3.bf16.msra.mxu1 %v4499_v8  ;;  %v4835_v33 = vand.u32 15, %v1153_v52 }
 0x20b   : > { %3843 = vmatprep.subr.bf16.mxu1 %v4509_v12 }
 0x20c   : > { %vm1157_vm6 = vcmp.eq.s32.totalorder %v4835_v33, 0  ;;  %vm1159_vm10 = vcmp.eq.s32.totalorder %v4835_v33, 15  ;;  %v333_v33 = vld [vmem:[%s5336_s2 + $0x68] sm:$0xff] }
 0x20e   : > { %3845 = vmatpush3.bf16.msra.mxu1 %v4522_v17 }
 0x20f   : > { %3847 = vmatprep.subr.bf16.mxu1 %v4531_v20 }
 0x212   : > { %3849 = vmatpush3.bf16.msra.mxu1 %v4552_v31 }
 0x213   : > { %3851 = vmatprep.subr.bf16.mxu1 %v4561_v35 }
 0x216   : > { %3853 = vmatpush3.bf16.msra.mxu1 %v4594_v50 }
 0x217   : > { %3855 = vmatprep.subr.bf16.mxu1 %v4606_v55 }
 0x21a   : > { %3857 = vmatpush3.bf16.msra.mxu1 %v4608_v56 }
 0x21b   : > { %3859 = vmatprep.subr.bf16.mxu1 %v4621_v61 }
 0x21e   : > { %3861 = vmatpush3.bf16.msra.mxu1 %v4623_v62 }
 0x21f   : > { %3863 = vmatprep.subr.bf16.mxu1 %v4633_v3 }
 0x222   : > { %3865 = vmatpush3.bf16.msra.mxu1 %v4643_v13 }
 0x223   : > { %3867 = vmatprep.subr.bf16.mxu1 %v4645_v14 }
 0x226   : > { %3869 = vmatpush3.bf16.msra.mxu1 %v4647_v18 }
 0x2dc   : > { %v1144_v53 = vpop.f32.mrb[2].mxu1 }
 0x2dd   : > { %v4804_v54 = vadd.f32 %v1144_v53, %v1065_v1  ;;  %v1146_v57 = vpop.f32.mrb[3].mxu1 }
 0x2de   : > { %v4806_v58 = vadd.f32 %v1146_v57, %v1065_v1  ;;  %v4837_v1 = vand.u32 15, %v1152_v30 }
 0x2df   : > { %v1242_v0 = vmul.f32 %v4804_v54, %v4804_v54 }
 0x2e0   : > { %1236 = vmatprep.mubr.f32.mxu1 %v4806_v58  ;;  %v1243_v59 = vmul.f32 %v4806_v58, %v4806_v58  ;;  %vm1156_vm7 = vcmp.eq.s32.totalorder %v4837_v1, 0  ;;  %vm1158_vm11 = vcmp.eq.s32.totalorder %v4837_v1, 15 }
 0x2e1   : > { %1237 = vmatmul.mubr.f32.vlgmr.msra.gmra.mrb[4].mxu1 %v4804_v54 }
 0x2e2   : > { %1308 = vmatprep.mubr.f32.mxu0 %v1243_v59  ;;  %1635 = vmatprep.mubr.f32.mxu1 %v4409_v45 }
 0x2e3   : > { %1309 = vmatmul.mubr.f32.vlgmr.msra.gmra.mrb[4].mxu0 %v1242_v0 }
 0x2e4   : > { %1487 = vmatprep.mubr.f32.mxu0 %v4409_v45 }
 0x3b4   : > { %v3464_v2 = vpop.f32.mrb[4].mxu1 }
 0x3b5   : > { %v3465_v9 = vpop.f32.mrb[5].mxu1 }
 0x3b6   : > { %v3466_v19 = vadd.f32 %v3465_v9, %v3464_v2  ;;  %v3499_v22 = vpop.f32.mrb[4].mxu0 }
 0x3b7   : > { %v3500_v16 = vpop.f32.mrb[5].mxu0 }
 0x3b8   : > { %v1314_v15 = vmul.f32 %v3466_v19, %v3466_v19  ;;  %v3501_v63 = vadd.f32 %v3500_v16, %v3499_v22 }
 0x3ba   : > { %v1315_v5 = vsub.f32 %v3501_v63, %v1314_v15 }
 0x3bc   : > { %v1316_v25 = vadd.f32 1e-05, %v1315_v5 }
 0x3be   : > { %4354 = vrsqrt.f32 %v1316_v25 }
 0x3c8   : > { %v4355_v28 = vpop.eup %4354 }
 0x3c9   : > { %v1318_v21 = vmul.f32 %v4355_v28, %v322_v34 }
 0x3cb   : > { %1323 = vperm.xlu1 %4222, %v1318_v21   ;;  %v1319_v38 = vmul.f32 %v3466_v19, %v1318_v21 }
 0x3cd   : > { %v1320_v6 = vsub.f32 %v326_v23, %v1319_v38 }
 0x3cf   : > { %1330 = vperm.xlu0 %4221, %v1320_v6  }
 0x44a   : > { %v1324_v39 = vpop.permute.xlu1 %1323 }
 0x44b   : > { %v1326_v40 = vmul.f32 %v1324_v39, %v4804_v54  ;;  %v1327_v42 = vmul.f32 %v1324_v39, %v4806_v58 }
 0x44e   : > { %v1331_v7 = vpop.permute.xlu0 %1330 }
 0x44f   : > { %v1333_v10 = vadd.f32 %v1331_v7, %v1326_v40  ;;  %v1334_v43 = vadd.f32 %v1331_v7, %v1327_v42 }
 0x451   : > { %v3330_v44 = vmul.f32 -1.442695, %v1333_v10  ;;  %v3331_v26 = vmul.f32 -1.442695, %v1334_v43 }
 0x453   : > { %4356 = vpow2.f32 %v3330_v44  ;;  %v1161_v44 = vld [vmem:[%s5338_s4 + $0x8] sm:$0xff] }
 0x454   : > { %4358 = vpow2.f32 %v3331_v26  ;;  %v334_v26 = vld [vmem:[%s5336_s2 + $0x70] sm:$0xff] }
 0x45d   : > { %v4357_v29 = vpop.eup %4356 }
 0x45e   : > { %v4359_v27 = vpop.eup %4358  ;;  %v1341_v24 = vadd.f32 1.0, %v4357_v29  ;;  %v872_v29 = vadd.f32 %v4771_v37, %v334_v26 }
 0x45f   : > { %v1342_v32 = vadd.f32 1.0, %v4359_v27  ;;  %v330_v27 = vld [vmem:[%s5336_s2 + $0x50] sm:$0xff] }
 0x460   : > { %4360 = vrcp.f32 %v1341_v24  ;;  %v1644_v24 = vadd.f32 %v872_v29, %v330_v27 }
 0x461   : > { %4362 = vrcp.f32 %v1342_v32 }
 0x46a   : > { %v4361_v60 = vpop.eup %4360 }
 0x46b   : > { %v4363_v41 = vpop.eup %4362  ;;  %v1347_v46 = vmul.f32 %v4361_v60, %v1333_v10 }
 0x46c   : > { %v1348_v47 = vmul.f32 %v4363_v41, %v1334_v43 }
 0x46e   : > { %v4228_v48 = vpack.i.bf16 %v1348_v47, %v1347_v46 }
 0x470   : > { %4229 = vrot.lane.b32.xlu0 %v4228_v48, %s4411_s18  ;;  %4224 = vrot.lane.b32.xlu1 %v4228_v48, %s4412_s19 }
 0x474   : > { %1367 = vrot.lane.b32.xlu0 %v1348_v47, %s4413_s20  ;;  %1365 = vrot.lane.b32.xlu1 %v1347_v46, %s4413_s20 }
 0x478   : > { %1374 = vrot.lane.b32.xlu0 %v1348_v47, %s4414_s21  ;;  %1372 = vrot.lane.b32.xlu1 %v1347_v46, %s4414_s21 }
 0x4e2   : > { %v4230_v53 = vpop.permute.xlu0 %4229  ;;  %v4225_v57 = vpop.permute.xlu1 %4224 }
 0x4e3   : > { %v4232_v11 = vunpack.i.h.bf16 %v4230_v53  ;;  %v4231_v59 = vunpack.i.l.bf16 %v4230_v53  ;;  %v4227_v0 = vunpack.i.h.bf16 %v4225_v57  ;;  %v4226_v2 = vunpack.i.l.bf16 %v4225_v57 }
 0x4e5   : > { %v1361_v9 = vsel %vm1360_vm4, %v4231_v59, %v4232_v11  ;;  %v1362_v19 = vsel %vm1360_vm4, %v4232_v11, %v4231_v59  ;;  %v1354_v22 = vsel %vm1353_vm5, %v4226_v2, %v4227_v0  ;;  %v1355_v16 = vsel %vm1353_vm5, %v4227_v0, %v4226_v2 }
 0x4e6   : > { %v1368_v15 = vpop.permute.xlu0 %1367  ;;  %v1366_v63 = vpop.permute.xlu1 %1365  ;;  %v1364_v5 = vsel %vm1157_vm6, %v1355_v16, %v1361_v9  ;;  %v1363_v25 = vsel %vm1156_vm7, %v1354_v22, %v1362_v19 }
 0x4e7   : > { %v4238_v34 = vpack.i.bf16 %v1348_v47, %v1364_v5  ;;  %v3902_v28 = vpack.c.bf16 %v1348_v47, %v1364_v5  ;;  %v4233_v21 = vpack.i.bf16 %v1347_v46, %v1363_v25  ;;  %v3904_v23 = vpack.c.bf16 %v1347_v46, %v1363_v25 }
 0x4e8   : > { %v1370_v38 = vsel %vm1369_vm8, %v1366_v63, %v1368_v15  ;;  %v1371_v40 = vsel %vm1369_vm8, %v1368_v15, %v1366_v63 }
 0x4e9   : > { %4239 = vrot.lane.b32.xlu0 %v4238_v34, %s4415_s22  ;;  %3903 = vmatprep.subr.bf16.mxu0 %v3902_v28 }
 0x4ea   : > { %4234 = vrot.lane.b32.xlu1 %v4233_v21, %s4415_s22  ;;  %v1375_v6 = vpop.permute.xlu0 %1374  ;;  %v1373_v39 = vpop.permute.xlu1 %1372  ;;  %3905 = vmatpush1.bf16.msra.mxu0 %v3904_v23 }
 0x4eb   : > { %v1377_v42 = vsel %vm1376_vm9, %v1373_v39, %v1375_v6  ;;  %v1378_v7 = vsel %vm1376_vm9, %v1375_v6, %v1373_v39 }
 0x4ec   : > { %v1380_v10 = vsel %vm1159_vm10, %v1370_v38, %v1378_v7  ;;  %v1379_v43 = vsel %vm1158_vm11, %v1371_v40, %v1377_v42  ;;  %v1160_v38 = vld [vmem:[%s5338_s4] sm:$0xff]  ;;  %v1162_v7 = vld [vmem:[%s5338_s4 + $0x10] sm:$0xff] }
 0x4ed   : > { %4249 = vrot.lane.b32.xlu0 %v4238_v34, %s4416_s25  ;;  %1427 = vmatprep.subr.mxu0 %v1380_v10 }
 0x4ee   : > { %4244 = vrot.lane.b32.xlu1 %v4233_v21, %s4416_s25  ;;  %1428 = vmatpush1.msra.mxu0 %v1379_v43 }
 0x4ef   : > { %3332 = vmatmul.mubr.msk.f32.vlgmr.msra.gmra.mrb[6].mxu0 %vm1419_vm12, %v1161_v44 }
 0x4f0   : > { %1561 = vmatprep.mubr.f32.mxu0 %v4409_v45 }
 0x4f1   : > { %1391 = vrot.lane.b32.xlu0 %v1380_v10, %s4415_s22 }
 0x4f2   : > { %1385 = vrot.lane.b32.xlu1 %v1379_v43, %s4415_s22 }
 0x4f5   : > { %1410 = vrot.lane.b32.xlu0 %v1380_v10, %s4416_s25 }
 0x4f6   : > { %1404 = vrot.lane.b32.xlu1 %v1379_v43, %s4416_s25 }
 0x4fa   : > { %1647 = vperm.xlu1 %4222, %v1644_v24  }
 0x55b   : > { %v4240_v32 = vpop.permute.xlu0 %4239 }
 0x55c   : > { %v4242_v60 = vunpack.i.h.bf16 %v4240_v32  ;;  %v4241_v41 = vunpack.i.l.bf16 %v4240_v32  ;;  %v4235_v46 = vpop.permute.xlu1 %4234 }
 0x55d   : > { %v4237_v47 = vunpack.i.h.bf16 %v4235_v46  ;;  %v4236_v48 = vunpack.i.l.bf16 %v4235_v46 }
 0x55f   : > { %v1398_v37 = vsel %vm1393_vm13, %v4242_v60, %v4237_v47  ;;  %v1397_v51 = vsel %vm1393_vm13, %v4241_v41, %v4236_v48  ;;  %v4250_v52 = vpop.permute.xlu0 %4249  ;;  %v1394_v30 = vsel %vm1393_vm13, %v4236_v48, %v4241_v41  ;;  %v1395_v53 = vsel %vm1393_vm13, %v4237_v47, %v4242_v60 }
 0x560   : > { %v3908_v57 = vpack.c.bf16 %v1398_v37, %v1397_v51  ;;  %v4252_v11 = vunpack.i.h.bf16 %v4250_v52  ;;  %v4251_v59 = vunpack.i.l.bf16 %v4250_v52  ;;  %v4245_v0 = vpop.permute.xlu1 %4244  ;;  %v3906_v2 = vpack.c.bf16 %v1395_v53, %v1394_v30 }
 0x561   : > { %v4247_v9 = vunpack.i.h.bf16 %v4245_v0  ;;  %v4246_v19 = vunpack.i.l.bf16 %v4245_v0 }
 0x562   : > { %3907 = vmatprep.subr.bf16.mxu0 %v3906_v2 }
 0x563   : > { %v1414_v22 = vsel %vm1412_vm14, %v4247_v9, %v4252_v11  ;;  %v1413_v16 = vsel %vm1412_vm14, %v4246_v19, %v4251_v59  ;;  %3909 = vmatpush1.bf16.msra.mxu0 %v3908_v57  ;;  %v1392_v15 = vpop.permute.xlu0 %1391  ;;  %v1416_v63 = vsel %vm1412_vm14, %v4251_v59, %v4246_v19  ;;  %v1417_v5 = vsel %vm1412_vm14, %v4252_v11, %v4247_v9  ;;  %v323_v59 = vld [vmem:[%s5336_s2 + $0x18] sm:$0xff] }
 0x564   : > { %v3912_v25 = vpack.c.bf16 %v1414_v22, %v1413_v16  ;;  %v1386_v34 = vpop.permute.xlu1 %1385  ;;  %v3910_v28 = vpack.c.bf16 %v1417_v5, %v1416_v63  ;;  %v327_v9 = vld [vmem:[%s5336_s2 + $0x38] sm:$0xff] }
 0x565   : > { %v1399_v21 = vsel %vm1393_vm13, %v1392_v15, %v1386_v34  ;;  %v1396_v23 = vsel %vm1393_vm13, %v1386_v34, %v1392_v15 }
 0x566   : > { %1501 = vmatprep.subr.mxu0 %v1396_v23  ;;  %3911 = vmatprep.subr.bf16.mxu1 %v3910_v28 }
 0x567   : > { %1502 = vmatpush1.msra.mxu0 %v1399_v21  ;;  %3913 = vmatpush1.bf16.msra.mxu1 %v3912_v25  ;;  %v1411_v6 = vpop.permute.xlu0 %1410 }
 0x568   : > { %v1405_v39 = vpop.permute.xlu1 %1404  ;;  %3333 = vmatmul.mubr.msk.f32.vlgmr.msra.gmra.mrb[6].mxu0 %vm1419_vm12, %v1160_v38  ;;  %3915 = vmatprep.subr.bf16.mxu0 %v4484_v4 }
 0x569   : > { %v1415_v40 = vsel %vm1412_vm14, %v1405_v39, %v1411_v6  ;;  %v1418_v42 = vsel %vm1412_vm14, %v1411_v6, %v1405_v39  ;;  %3917 = vmatpush3.bf16.msra.mxu0 %v4499_v8 }
 0x56a   : > { %1575 = vmatprep.subr.mxu1 %v1418_v42  ;;  %3919 = vmatprep.subr.bf16.mxu0 %v4509_v12 }
 0x56b   : > { %1576 = vmatpush1.msra.mxu1 %v1415_v40 }
 0x56c   : > { %3334 = vmatmul.mubr.msk.f32.vlgmr.msra.gmra.mrb[6].mxu1 %vm1419_vm12, %v1162_v7  ;;  %3947 = vmatprep.subr.bf16.mxu1 %v4484_v4 }
 0x56d   : > { %3949 = vmatpush3.bf16.msra.mxu1 %v4499_v8  ;;  %3921 = vmatpush3.bf16.msra.mxu0 %v4522_v17 }
 0x56e   : > { %3951 = vmatprep.subr.bf16.mxu1 %v4509_v12  ;;  %3923 = vmatprep.subr.bf16.mxu0 %v4531_v20 }
 0x571   : > { %3953 = vmatpush3.bf16.msra.mxu1 %v4522_v17  ;;  %3925 = vmatpush3.bf16.msra.mxu0 %v4552_v31 }
 0x572   : > { %3955 = vmatprep.subr.bf16.mxu1 %v4531_v20  ;;  %3927 = vmatprep.subr.bf16.mxu0 %v4561_v35 }
 0x575   : > { %3957 = vmatpush3.bf16.msra.mxu1 %v4552_v31  ;;  %3929 = vmatpush3.bf16.msra.mxu0 %v4594_v50 }
 0x576   : > { %3959 = vmatprep.subr.bf16.mxu1 %v4561_v35  ;;  %3931 = vmatprep.subr.bf16.mxu0 %v4606_v55 }
 0x579   : > { %3961 = vmatpush3.bf16.msra.mxu1 %v4594_v50  ;;  %3933 = vmatpush3.bf16.msra.mxu0 %v4608_v56  ;;  %v1648_v27 = vpop.permute.xlu1 %1647 }
 0x57a   : > { %3963 = vmatprep.subr.bf16.mxu1 %v4606_v55  ;;  %3935 = vmatprep.subr.bf16.mxu0 %v4621_v61 }
 0x57d   : > { %3965 = vmatpush3.bf16.msra.mxu1 %v4608_v56  ;;  %3937 = vmatpush3.bf16.msra.mxu0 %v4623_v62 }
 0x57e   : > { %3967 = vmatprep.subr.bf16.mxu1 %v4621_v61  ;;  %3939 = vmatprep.subr.bf16.mxu0 %v4633_v3 }
 0x581   : > { %3969 = vmatpush3.bf16.msra.mxu1 %v4623_v62  ;;  %3941 = vmatpush3.bf16.msra.mxu0 %v4643_v13 }
 0x582   : > { %3971 = vmatprep.subr.bf16.mxu1 %v4633_v3  ;;  %3943 = vmatprep.subr.bf16.mxu0 %v4645_v14 }
 0x585   : > { %3973 = vmatpush3.bf16.msra.mxu1 %v4643_v13  ;;  %3945 = vmatpush3.bf16.msra.mxu0 %v4647_v18 }
 0x586   : > { %3975 = vmatprep.subr.bf16.mxu1 %v4645_v14 }
 0x589   : > { %3977 = vmatpush3.bf16.msra.mxu1 %v4647_v18 }
 0x58a   : > { %3991 = vmatprep.subr.bf16.mxu1 %v4484_v4 }
 0x63b   : > { %v1563_v10 = vpop.f32.mrb[6].mxu0 }
 0x63c   : > { %v1565_v43 = vpop.f32.mrb[7].mxu0 }
 0x63f   : > { %v1637_v44 = vpop.f32.mrb[6].mxu1 }
 0x640   : > { %v4174_v26 = vadd.f32 %v1637_v44, %v1563_v10  ;;  %v1639_v29 = vpop.f32.mrb[7].mxu1 }
 0x641   : > { %v4175_v24 = vadd.f32 %v1639_v29, %v1565_v43 }
 0x642   : > { %v1650_v32 = vadd.f32 %v4174_v26, %v1648_v27 }
 0x643   : > { %v1651_v60 = vadd.f32 %v4175_v24, %v1648_v27 }
 0x644   : > { %v1722_v46 = vmul.f32 %v1650_v32, %v1650_v32 }
 0x645   : > { %1716 = vmatprep.mubr.f32.mxu0 %v1651_v60  ;;  %v1723_v41 = vmul.f32 %v1651_v60, %v1651_v60 }
 0x646   : > { %1717 = vmatmul.mubr.f32.vlgmr.msra.gmra.mrb[8].mxu0 %v1650_v32 }
 0x647   : > { %1788 = vmatprep.mubr.f32.mxu1 %v1723_v41  ;;  %1960 = vmatprep.mubr.f32.mxu0 %v4409_v45 }
 0x648   : > { %1789 = vmatmul.mubr.f32.vlgmr.msra.gmra.mrb[8].mxu1 %v1722_v46 }
 0x649   : > { %3993 = vmatpush3.bf16.msra.mxu1 %v4499_v8 }
 0x64a   : > { %3995 = vmatprep.subr.bf16.mxu1 %v4509_v12 }
 0x64d   : > { %3997 = vmatpush3.bf16.msra.mxu1 %v4522_v17 }
 0x64e   : > { %3999 = vmatprep.subr.bf16.mxu1 %v4531_v20 }
 0x651   : > { %4001 = vmatpush3.bf16.msra.mxu1 %v4552_v31 }
 0x652   : > { %4003 = vmatprep.subr.bf16.mxu1 %v4561_v35 }
 0x655   : > { %4005 = vmatpush3.bf16.msra.mxu1 %v4594_v50 }
 0x656   : > { %4007 = vmatprep.subr.bf16.mxu1 %v4606_v55 }
 0x659   : > { %4009 = vmatpush3.bf16.msra.mxu1 %v4608_v56 }
 0x65a   : > { %4011 = vmatprep.subr.bf16.mxu1 %v4621_v61 }
 0x65d   : > { %4013 = vmatpush3.bf16.msra.mxu1 %v4623_v62 }
 0x65e   : > { %4015 = vmatprep.subr.bf16.mxu1 %v4633_v3 }
 0x661   : > { %4017 = vmatpush3.bf16.msra.mxu1 %v4643_v13 }
 0x662   : > { %4019 = vmatprep.subr.bf16.mxu1 %v4645_v14 }
 0x665   : > { %4021 = vmatpush3.bf16.msra.mxu1 %v4647_v18 }
 0x719   : > { %v3534_v47 = vpop.f32.mrb[8].mxu0 }
 0x71a   : > { %v3535_v48 = vpop.f32.mrb[9].mxu0 }
 0x71b   : > { %v3536_v37 = vadd.f32 %v3535_v48, %v3534_v47  ;;  %v3569_v51 = vpop.f32.mrb[8].mxu1 }
 0x71c   : > { %v3570_v52 = vpop.f32.mrb[9].mxu1 }
 0x71d   : > { %v1794_v30 = vmul.f32 %v3536_v37, %v3536_v37  ;;  %v3571_v53 = vadd.f32 %v3570_v52, %v3569_v51 }
 0x71f   : > { %v1795_v57 = vsub.f32 %v3571_v53, %v1794_v30 }
 0x721   : > { %v1796_v11 = vadd.f32 1e-05, %v1795_v57 }
 0x723   : > { %4364 = vrsqrt.f32 %v1796_v11 }
 0x72d   : > { %v4365_v0 = vpop.eup %4364 }
 0x72e   : > { %v1798_v2 = vmul.f32 %v4365_v0, %v323_v59 }
 0x730   : > { %1803 = vperm.xlu0 %4221, %v1798_v2   ;;  %v1799_v19 = vmul.f32 %v3536_v37, %v1798_v2 }
 0x732   : > { %v1800_v22 = vsub.f32 %v327_v9, %v1799_v19 }
 0x734   : > { %1810 = vperm.xlu1 %4222, %v1800_v22  }
 0x7af   : > { %v1804_v16 = vpop.permute.xlu0 %1803 }
 0x7b0   : > { %v1806_v15 = vmul.f32 %v1804_v16, %v1650_v32  ;;  %v1807_v63 = vmul.f32 %v1804_v16, %v1651_v60 }
 0x7b3   : > { %v1811_v5 = vpop.permute.xlu1 %1810 }
 0x7b4   : > { %v1813_v25 = vadd.f32 %v1811_v5, %v1806_v15  ;;  %v1814_v34 = vadd.f32 %v1811_v5, %v1807_v63  ;;  %v1164_v63 = vld [vmem:[%s5338_s4 + $0x20] sm:$0xff]  ;;  %v331_v5 = vld [vmem:[%s5336_s2 + $0x58] sm:$0xff] }
 0x7b6   : > { %v3335_v28 = vmul.f32 -1.442695, %v1813_v25  ;;  %v3336_v21 = vmul.f32 -1.442695, %v1814_v34 }
 0x7b8   : > { %4366 = vpow2.f32 %v3335_v28 }
 0x7b9   : > { %4368 = vpow2.f32 %v3336_v21 }
 0x7c2   : > { %v4367_v23 = vpop.eup %4366 }
 0x7c3   : > { %v4369_v38 = vpop.eup %4368  ;;  %v1821_v6 = vadd.f32 1.0, %v4367_v23 }
 0x7c4   : > { %v1822_v39 = vadd.f32 1.0, %v4369_v38 }
 0x7c5   : > { %4370 = vrcp.f32 %v1821_v6 }
 0x7c6   : > { %4372 = vrcp.f32 %v1822_v39 }
 0x7cf   : > { %v4371_v40 = vpop.eup %4370 }
 0x7d0   : > { %v4373_v42 = vpop.eup %4372  ;;  %v1827_v7 = vmul.f32 %v4371_v40, %v1813_v25 }
 0x7d1   : > { %v1828_v10 = vmul.f32 %v4373_v42, %v1814_v34 }
 0x7d3   : > { %v4258_v43 = vpack.i.bf16 %v1828_v10, %v1827_v7 }
 0x7d5   : > { %4259 = vrot.lane.b32.xlu1 %v4258_v43, %s4411_s18  ;;  %4254 = vrot.lane.b32.xlu0 %v4258_v43, %s4412_s19 }
 0x7d9   : > { %1845 = vrot.lane.b32.xlu1 %v1828_v10, %s4413_s20  ;;  %1843 = vrot.lane.b32.xlu0 %v1827_v7, %s4413_s20 }
 0x7dd   : > { %1851 = vrot.lane.b32.xlu1 %v1828_v10, %s4414_s21  ;;  %1849 = vrot.lane.b32.xlu0 %v1827_v7, %s4414_s21 }
 0x847   : > { %v4260_v44 = vpop.permute.xlu1 %4259  ;;  %v4255_v26 = vpop.permute.xlu0 %4254 }
 0x848   : > { %v4262_v29 = vunpack.i.h.bf16 %v4260_v44  ;;  %v4261_v27 = vunpack.i.l.bf16 %v4260_v44  ;;  %v4257_v24 = vunpack.i.h.bf16 %v4255_v26  ;;  %v4256_v32 = vunpack.i.l.bf16 %v4255_v26 }
 0x84a   : > { %v1839_v60 = vsel %vm1360_vm4, %v4261_v27, %v4262_v29  ;;  %v1840_v41 = vsel %vm1360_vm4, %v4262_v29, %v4261_v27  ;;  %v1833_v46 = vsel %vm1353_vm5, %v4256_v32, %v4257_v24  ;;  %v1834_v47 = vsel %vm1353_vm5, %v4257_v24, %v4256_v32 }
 0x84b   : > { %v1846_v48 = vpop.permute.xlu1 %1845  ;;  %v1844_v37 = vpop.permute.xlu0 %1843  ;;  %v1842_v51 = vsel %vm1157_vm6, %v1834_v47, %v1839_v60  ;;  %v1841_v52 = vsel %vm1156_vm7, %v1833_v46, %v1840_v41  ;;  %v1163_v46 = vld [vmem:[%s5338_s4 + $0x18] sm:$0xff] }
 0x84c   : > { %v4268_v30 = vpack.i.bf16 %v1828_v10, %v1842_v51  ;;  %v3978_v53 = vpack.c.bf16 %v1828_v10, %v1842_v51  ;;  %v4263_v57 = vpack.i.bf16 %v1827_v7, %v1841_v52  ;;  %v3980_v11 = vpack.c.bf16 %v1827_v7, %v1841_v52 }
 0x84d   : > { %v1847_v2 = vsel %vm1369_vm8, %v1844_v37, %v1846_v48  ;;  %v1848_v9 = vsel %vm1369_vm8, %v1846_v48, %v1844_v37 }
 0x84e   : > { %4269 = vrot.lane.b32.xlu1 %v4268_v30, %s4415_s22  ;;  %3979 = vmatprep.subr.bf16.mxu0 %v3978_v53 }
 0x84f   : > { %4264 = vrot.lane.b32.xlu0 %v4263_v57, %s4415_s22  ;;  %v1852_v59 = vpop.permute.xlu1 %1851  ;;  %v1850_v0 = vpop.permute.xlu0 %1849  ;;  %3981 = vmatpush1.bf16.msra.mxu0 %v3980_v11 }
 0x850   : > { %v1853_v19 = vsel %vm1376_vm9, %v1850_v0, %v1852_v59  ;;  %v1854_v22 = vsel %vm1376_vm9, %v1852_v59, %v1850_v0  ;;  %v1165_v0 = vld [vmem:[%s5338_s4 + $0x28] sm:$0xff] }
 0x851   : > { %v1856_v16 = vsel %vm1159_vm10, %v1847_v2, %v1854_v22  ;;  %v1855_v15 = vsel %vm1158_vm11, %v1848_v9, %v1853_v19 }
 0x852   : > { %1867 = vrot.lane.b32.xlu1 %v1856_v16, %s4415_s22  ;;  %1900 = vmatprep.subr.mxu0 %v1856_v16 }
 0x853   : > { %1861 = vrot.lane.b32.xlu0 %v1855_v15, %s4415_s22  ;;  %1901 = vmatpush1.msra.mxu0 %v1855_v15 }
 0x854   : > { %3337 = vmatmul.mubr.msk.f32.vlgmr.msra.gmra.mrb[10].mxu0 %vm1419_vm12, %v1164_v63 }
 0x855   : > { %2034 = vmatprep.mubr.f32.mxu0 %v4409_v45 }
 0x856   : > { %4279 = vrot.lane.b32.xlu1 %v4268_v30, %s4416_s25 }
 0x857   : > { %4274 = vrot.lane.b32.xlu0 %v4263_v57, %s4416_s25 }
 0x85a   : > { %1885 = vrot.lane.b32.xlu1 %v1856_v16, %s4416_s25 }
 0x85b   : > { %1879 = vrot.lane.b32.xlu0 %v1855_v15, %s4416_s25 }
 0x85f   : > { %2119 = vperm.xlu0 %4221, %v331_v5  }
 0x8c0   : > { %v4270_v25 = vpop.permute.xlu1 %4269 }
 0x8c1   : > { %v4272_v34 = vunpack.i.h.bf16 %v4270_v25  ;;  %v4271_v28 = vunpack.i.l.bf16 %v4270_v25  ;;  %v4265_v21 = vpop.permute.xlu0 %4264 }
 0x8c2   : > { %v4267_v23 = vunpack.i.h.bf16 %v4265_v21  ;;  %v4266_v38 = vunpack.i.l.bf16 %v4265_v21 }
 0x8c4   : > { %v1873_v6 = vsel %vm1393_vm13, %v4272_v34, %v4267_v23  ;;  %v1872_v39 = vsel %vm1393_vm13, %v4271_v28, %v4266_v38  ;;  %v1868_v40 = vpop.permute.xlu1 %1867  ;;  %v1869_v42 = vsel %vm1393_vm13, %v4266_v38, %v4271_v28  ;;  %v1870_v7 = vsel %vm1393_vm13, %v4267_v23, %v4272_v34 }
 0x8c5   : > { %v3984_v10 = vpack.c.bf16 %v1873_v6, %v1872_v39  ;;  %v1862_v43 = vpop.permute.xlu0 %1861  ;;  %v3982_v44 = vpack.c.bf16 %v1870_v7, %v1869_v42 }
 0x8c6   : > { %v1871_v29 = vsel %vm1393_vm13, %v1862_v43, %v1868_v40  ;;  %v1874_v47 = vsel %vm1393_vm13, %v1868_v40, %v1862_v43 }
 0x8c7   : > { %3983 = vmatprep.subr.bf16.mxu0 %v3982_v44 }
 0x8c8   : > { %3985 = vmatpush1.bf16.msra.mxu0 %v3984_v10  ;;  %v4280_v26 = vpop.permute.xlu1 %4279  ;;  %v324_v10 = vld [vmem:[%s5336_s2 + $0x20] sm:$0xff] }
 0x8c9   : > { %v4282_v27 = vunpack.i.h.bf16 %v4280_v26  ;;  %v4281_v24 = vunpack.i.l.bf16 %v4280_v26  ;;  %v4275_v32 = vpop.permute.xlu0 %4274  ;;  %1974 = vmatprep.subr.mxu0 %v1871_v29  ;;  %v328_v26 = vld [vmem:[%s5336_s2 + $0x40] sm:$0xff] }
 0x8ca   : > { %v4277_v60 = vunpack.i.h.bf16 %v4275_v32  ;;  %v4276_v41 = vunpack.i.l.bf16 %v4275_v32 }
 0x8cc   : > { %v1888_v48 = vsel %vm1412_vm14, %v4277_v60, %v4282_v27  ;;  %v1887_v37 = vsel %vm1412_vm14, %v4276_v41, %v4281_v24  ;;  %1975 = vmatpush1.msra.mxu0 %v1874_v47  ;;  %v1890_v51 = vsel %vm1412_vm14, %v4281_v24, %v4276_v41  ;;  %v1891_v52 = vsel %vm1412_vm14, %v4282_v27, %v4277_v60  ;;  %v1886_v53 = vpop.permute.xlu1 %1885 }
 0x8cd   : > { %v3988_v30 = vpack.c.bf16 %v1888_v48, %v1887_v37  ;;  %v1880_v57 = vpop.permute.xlu0 %1879  ;;  %3338 = vmatmul.mubr.msk.f32.vlgmr.msra.gmra.mrb[10].mxu0 %vm1419_vm12, %v1163_v46  ;;  %v3986_v11 = vpack.c.bf16 %v1891_v52, %v1890_v51 }
 0x8ce   : > { %2108 = vmatprep.mubr.f32.mxu0 %v4409_v45  ;;  %v1892_v59 = vsel %vm1412_vm14, %v1886_v53, %v1880_v57  ;;  %v1889_v2 = vsel %vm1412_vm14, %v1880_v57, %v1886_v53 }
 0x8cf   : > { %3987 = vmatprep.subr.bf16.mxu0 %v3986_v11 }
 0x8d0   : > { %3989 = vmatpush1.bf16.msra.mxu0 %v3988_v30 }
 0x8d1   : > { %2048 = vmatprep.subr.mxu0 %v1892_v59 }
 0x8d4   : > { %2049 = vmatpush1.msra.mxu0 %v1889_v2 }
 0x8d5   : > { %3339 = vmatmul.mubr.msk.f32.vlgmr.msra.gmra.mrb[10].mxu0 %vm1419_vm12, %v1165_v0  ;;  %4023 = vmatprep.subr.bf16.mxu0 %v4484_v4 }
 0x8d6   : > { %4025 = vmatpush3.bf16.msra.mxu0 %v4499_v8 }
 0x8d7   : > { %4027 = vmatprep.subr.bf16.mxu0 %v4509_v12 }
 0x8da   : > { %4029 = vmatpush3.bf16.msra.mxu0 %v4522_v17 }
 0x8db   : > { %4031 = vmatprep.subr.bf16.mxu0 %v4531_v20 }
 0x8de   : > { %4033 = vmatpush3.bf16.msra.mxu0 %v4552_v31  ;;  %v2120_v9 = vpop.permute.xlu0 %2119 }
 0x8df   : > { %4035 = vmatprep.subr.bf16.mxu0 %v4561_v35 }
 0x8e2   : > { %4037 = vmatpush3.bf16.msra.mxu0 %v4594_v50 }
 0x8e3   : > { %4039 = vmatprep.subr.bf16.mxu0 %v4606_v55 }
 0x8e6   : > { %4041 = vmatpush3.bf16.msra.mxu0 %v4608_v56 }
 0x8e7   : > { %4043 = vmatprep.subr.bf16.mxu0 %v4621_v61 }
 0x8ea   : > { %4045 = vmatpush3.bf16.msra.mxu0 %v4623_v62 }
 0x8eb   : > { %4047 = vmatprep.subr.bf16.mxu0 %v4633_v3 }
 0x8ee   : > { %4049 = vmatpush3.bf16.msra.mxu0 %v4643_v13 }
 0x8ef   : > { %4051 = vmatprep.subr.bf16.mxu0 %v4645_v14 }
 0x8f2   : > { %4053 = vmatpush3.bf16.msra.mxu0 %v4647_v18 }
 0x8f3   : > { %4067 = vmatprep.subr.bf16.mxu0 %v4484_v4 }
 0x9a8   : > { %v2110_v19 = vpop.f32.mrb[10].mxu0 }
 0x9a9   : > { %v2122_v22 = vadd.f32 %v2120_v9, %v2110_v19  ;;  %v2112_v16 = vpop.f32.mrb[11].mxu0 }
 0x9aa   : > { %v2123_v15 = vadd.f32 %v2120_v9, %v2112_v16 }
 0x9ab   : > { %v2124_v63 = vadd.f32 %v2122_v22, %v4804_v54 }
 0x9ac   : > { %v2125_v5 = vadd.f32 %v2123_v15, %v4806_v58 }
 0x9ad   : > { %v5078_v25 = vmul.f32 0.70710677, %v2124_v63 }
 0x9ae   : > { %v5080_v34 = vmul.f32 0.70710677, %v2125_v5 }
 0x9af   : > { %v2198_v21 = vmul.f32 %v5078_v25, %v5078_v25 }
 0x9b0   : > { %2192 = vmatprep.mubr.f32.mxu1 %v5080_v34  ;;  %v2199_v28 = vmul.f32 %v5080_v34, %v5080_v34 }
 0x9b1   : > { %2193 = vmatmul.mubr.f32.vlgmr.msra.gmra.mrb[10].mxu1 %v5078_v25 }
 0x9b2   : > { %2264 = vmatprep.mubr.f32.mxu0 %v2199_v28  ;;  %2436 = vmatprep.mubr.f32.mxu1 %v4409_v45 }
 0x9b3   : > { %2265 = vmatmul.mubr.f32.vlgmr.msra.gmra.mrb[12].mxu0 %v2198_v21 }
 0x9b4   : > { %4069 = vmatpush3.bf16.msra.mxu0 %v4499_v8 }
 0x9b5   : > { %4071 = vmatprep.subr.bf16.mxu0 %v4509_v12 }
 0x9b8   : > { %4073 = vmatpush3.bf16.msra.mxu0 %v4522_v17 }
 0x9b9   : > { %4075 = vmatprep.subr.bf16.mxu0 %v4531_v20 }
 0x9bc   : > { %4077 = vmatpush3.bf16.msra.mxu0 %v4552_v31 }
 0x9bd   : > { %4079 = vmatprep.subr.bf16.mxu0 %v4561_v35 }
 0x9c0   : > { %4081 = vmatpush3.bf16.msra.mxu0 %v4594_v50 }
 0x9c1   : > { %4083 = vmatprep.subr.bf16.mxu0 %v4606_v55 }
 0x9c4   : > { %4085 = vmatpush3.bf16.msra.mxu0 %v4608_v56 }
 0x9c5   : > { %4087 = vmatprep.subr.bf16.mxu0 %v4621_v61 }
 0x9c8   : > { %4089 = vmatpush3.bf16.msra.mxu0 %v4623_v62 }
 0x9c9   : > { %4091 = vmatprep.subr.bf16.mxu0 %v4633_v3 }
 0x9cc   : > { %4093 = vmatpush3.bf16.msra.mxu0 %v4643_v13 }
 0x9cd   : > { %4095 = vmatprep.subr.bf16.mxu0 %v4645_v14 }
 0x9d0   : > { %4097 = vmatpush3.bf16.msra.mxu0 %v4647_v18 }
 0xa84   : > { %v3604_v54 = vpop.f32.mrb[10].mxu1 }
 0xa85   : > { %v3605_v58 = vpop.f32.mrb[11].mxu1 }
 0xa86   : > { %v3606_v23 = vadd.f32 %v3605_v58, %v3604_v54  ;;  %v3639_v38 = vpop.f32.mrb[12].mxu0 }
 0xa87   : > { %v3640_v6 = vpop.f32.mrb[13].mxu0 }
 0xa88   : > { %v2270_v39 = vmul.f32 %v3606_v23, %v3606_v23  ;;  %v3641_v40 = vadd.f32 %v3640_v6, %v3639_v38 }
 0xa8a   : > { %v2271_v42 = vsub.f32 %v3641_v40, %v2270_v39 }
 0xa8c   : > { %v2272_v7 = vadd.f32 1e-05, %v2271_v42 }
 0xa8e   : > { %4374 = vrsqrt.f32 %v2272_v7 }
 0xa98   : > { %v4375_v43 = vpop.eup %4374 }
 0xa99   : > { %v2274_v44 = vmul.f32 %v4375_v43, %v324_v10 }
 0xa9b   : > { %2279 = vperm.xlu1 %4222, %v2274_v44   ;;  %v2275_v29 = vmul.f32 %v3606_v23, %v2274_v44 }
 0xa9d   : > { %v2276_v27 = vsub.f32 %v328_v26, %v2275_v29 }
 0xa9f   : > { %2286 = vperm.xlu0 %4221, %v2276_v27  }
 0xb1a   : > { %v2280_v24 = vpop.permute.xlu1 %2279 }
 0xb1b   : > { %v2282_v32 = vmul.f32 %v2280_v24, %v5078_v25  ;;  %v2283_v60 = vmul.f32 %v2280_v24, %v5080_v34 }
 0xb1e   : > { %v2287_v41 = vpop.permute.xlu0 %2286 }
 0xb1f   : > { %v2289_v46 = vadd.f32 %v2287_v41, %v2282_v32  ;;  %v2290_v47 = vadd.f32 %v2287_v41, %v2283_v60  ;;  %v1167_v60 = vld [vmem:[%s5338_s4 + $0x38] sm:$0xff] }
 0xb20   : > { %v335_v41 = vld [vmem:[%s5336_s2 + $0x78] sm:$0xff] }
 0xb21   : > { %v3340_v48 = vmul.f32 -1.442695, %v2289_v46  ;;  %v3341_v37 = vmul.f32 -1.442695, %v2290_v47 }
 0xb23   : > { %4376 = vpow2.f32 %v3340_v48 }
 0xb24   : > { %4378 = vpow2.f32 %v3341_v37 }
 0xb2d   : > { %v4377_v51 = vpop.eup %4376 }
 0xb2e   : > { %v4379_v52 = vpop.eup %4378  ;;  %v2297_v30 = vadd.f32 1.0, %v4377_v51 }
 0xb2f   : > { %v2298_v53 = vadd.f32 1.0, %v4379_v52 }
 0xb30   : > { %4380 = vrcp.f32 %v2297_v30 }
 0xb31   : > { %4382 = vrcp.f32 %v2298_v53 }
 0xb3a   : > { %v4381_v57 = vpop.eup %4380 }
 0xb3b   : > { %v4383_v11 = vpop.eup %4382  ;;  %v2303_v59 = vmul.f32 %v4381_v57, %v2289_v46  ;;  %v877_v46 = vadd.f32 %v4769_v36, %v335_v41 }
 0xb3c   : > { %v2304_v0 = vmul.f32 %v4383_v11, %v2290_v47  ;;  %v332_v47 = vld [vmem:[%s5336_s2 + $0x60] sm:$0xff] }
 0xb3d   : > { %v2593_v48 = vadd.f32 %v877_v46, %v332_v47 }
 0xb3e   : > { %v4288_v2 = vpack.i.bf16 %v2304_v0, %v2303_v59 }
 0xb40   : > { %4289 = vrot.lane.b32.xlu0 %v4288_v2, %s4411_s18  ;;  %4284 = vrot.lane.b32.xlu1 %v4288_v2, %s4412_s19 }
 0xb44   : > { %2321 = vrot.lane.b32.xlu0 %v2304_v0, %s4413_s20  ;;  %2319 = vrot.lane.b32.xlu1 %v2303_v59, %s4413_s20 }
 0xb48   : > { %2327 = vrot.lane.b32.xlu0 %v2304_v0, %s4414_s21  ;;  %2325 = vrot.lane.b32.xlu1 %v2303_v59, %s4414_s21 }
 0xbb2   : > { %v4290_v9 = vpop.permute.xlu0 %4289  ;;  %v4285_v19 = vpop.permute.xlu1 %4284 }
 0xbb3   : > { %v4292_v22 = vunpack.i.h.bf16 %v4290_v9  ;;  %v4291_v16 = vunpack.i.l.bf16 %v4290_v9  ;;  %v4287_v15 = vunpack.i.h.bf16 %v4285_v19  ;;  %v4286_v63 = vunpack.i.l.bf16 %v4285_v19 }
 0xbb5   : > { %v2315_v5 = vsel %vm1360_vm4, %v4291_v16, %v4292_v22  ;;  %v2316_v28 = vsel %vm1360_vm4, %v4292_v22, %v4291_v16  ;;  %v2309_v21 = vsel %vm1353_vm5, %v4286_v63, %v4287_v15  ;;  %v2310_v54 = vsel %vm1353_vm5, %v4287_v15, %v4286_v63 }
 0xbb6   : > { %v2322_v58 = vpop.permute.xlu0 %2321  ;;  %v2320_v23 = vpop.permute.xlu1 %2319  ;;  %v2318_v38 = vsel %vm1157_vm6, %v2310_v54, %v2315_v5  ;;  %v2317_v6 = vsel %vm1156_vm7, %v2309_v21, %v2316_v28 }
 0xbb7   : > { %v4298_v39 = vpack.i.bf16 %v2304_v0, %v2318_v38  ;;  %v4054_v40 = vpack.c.bf16 %v2304_v0, %v2318_v38  ;;  %v4293_v42 = vpack.i.bf16 %v2303_v59, %v2317_v6  ;;  %v4056_v7 = vpack.c.bf16 %v2303_v59, %v2317_v6 }
 0xbb8   : > { %v2323_v44 = vsel %vm1369_vm8, %v2320_v23, %v2322_v58  ;;  %v2324_v26 = vsel %vm1369_vm8, %v2322_v58, %v2320_v23  ;;  %v1166_v58 = vld [vmem:[%s5338_s4 + $0x30] sm:$0xff] }
 0xbb9   : > { %4299 = vrot.lane.b32.xlu0 %v4298_v39, %s4415_s22  ;;  %4055 = vmatprep.subr.bf16.mxu1 %v4054_v40 }
 0xbba   : > { %4294 = vrot.lane.b32.xlu1 %v4293_v42, %s4415_s22  ;;  %v2328_v10 = vpop.permute.xlu0 %2327  ;;  %v2326_v43 = vpop.permute.xlu1 %2325  ;;  %4057 = vmatpush1.bf16.msra.mxu1 %v4056_v7 }
 0xbbb   : > { %v2329_v29 = vsel %vm1376_vm9, %v2326_v43, %v2328_v10  ;;  %v2330_v27 = vsel %vm1376_vm9, %v2328_v10, %v2326_v43 }
 0xbbc   : > { %v2332_v24 = vsel %vm1159_vm10, %v2323_v44, %v2330_v27  ;;  %v2331_v32 = vsel %vm1158_vm11, %v2324_v26, %v2329_v29  ;;  %v1168_v26 = vld [vmem:[%s5338_s4 + $0x40] sm:$0xff] }
 0xbbd   : > { %2343 = vrot.lane.b32.xlu0 %v2332_v24, %s4415_s22  ;;  %2376 = vmatprep.subr.mxu1 %v2332_v24 }
 0xbbe   : > { %2337 = vrot.lane.b32.xlu1 %v2331_v32, %s4415_s22  ;;  %2377 = vmatpush1.msra.mxu1 %v2331_v32 }
 0xbbf   : > { %3342 = vmatmul.mubr.msk.f32.vlgmr.msra.gmra.mrb[12].mxu1 %vm1419_vm12, %v1167_v60 }
 0xbc0   : > { %2510 = vmatprep.mubr.f32.mxu1 %v4409_v45 }
 0xbc1   : > { %4309 = vrot.lane.b32.xlu0 %v4298_v39, %s4416_s25 }
 0xbc2   : > { %4304 = vrot.lane.b32.xlu1 %v4293_v42, %s4416_s25 }
 0xbc5   : > { %2361 = vrot.lane.b32.xlu0 %v2332_v24, %s4416_s25 }
 0xbc6   : > { %2355 = vrot.lane.b32.xlu1 %v2331_v32, %s4416_s25 }
 0xbca   : > { %2596 = vperm.xlu1 %4222, %v2593_v48  }
 0xc2b   : > { %v4300_v37 = vpop.permute.xlu0 %4299 }
 0xc2c   : > { %v4302_v51 = vunpack.i.h.bf16 %v4300_v37  ;;  %v4301_v52 = vunpack.i.l.bf16 %v4300_v37  ;;  %v4295_v30 = vpop.permute.xlu1 %4294 }
 0xc2d   : > { %v4297_v53 = vunpack.i.h.bf16 %v4295_v30  ;;  %v4296_v57 = vunpack.i.l.bf16 %v4295_v30 }
 0xc2f   : > { %v2349_v11 = vsel %vm1393_vm13, %v4302_v51, %v4297_v53  ;;  %v2348_v36 = vsel %vm1393_vm13, %v4301_v52, %v4296_v57  ;;  %v2344_v59 = vpop.permute.xlu0 %2343  ;;  %v2345_v0 = vsel %vm1393_vm13, %v4296_v57, %v4301_v52  ;;  %v2346_v2 = vsel %vm1393_vm13, %v4297_v53, %v4302_v51 }
 0xc30   : > { %v4060_v9 = vpack.c.bf16 %v2349_v11, %v2348_v36  ;;  %v2338_v19 = vpop.permute.xlu1 %2337  ;;  %v4058_v22 = vpack.c.bf16 %v2346_v2, %v2345_v0 }
 0xc31   : > { %v2347_v15 = vsel %vm1393_vm13, %v2338_v19, %v2344_v59  ;;  %v2350_v23 = vsel %vm1393_vm13, %v2344_v59, %v2338_v19 }
 0xc32   : > { %4059 = vmatprep.subr.bf16.mxu1 %v4058_v22 }
 0xc33   : > { %4061 = vmatpush1.bf16.msra.mxu1 %v4060_v9  ;;  %v4310_v16 = vpop.permute.xlu0 %4309 }
 0xc34   : > { %v4312_v63 = vunpack.i.h.bf16 %v4310_v16  ;;  %v4311_v5 = vunpack.i.l.bf16 %v4310_v16  ;;  %v4305_v28 = vpop.permute.xlu1 %4304  ;;  %2450 = vmatprep.subr.mxu1 %v2347_v15 }
 0xc35   : > { %v4307_v21 = vunpack.i.h.bf16 %v4305_v28  ;;  %v4306_v54 = vunpack.i.l.bf16 %v4305_v28 }
 0xc37   : > { %v2364_v38 = vsel %vm1412_vm14, %v4307_v21, %v4312_v63  ;;  %v2363_v6 = vsel %vm1412_vm14, %v4306_v54, %v4311_v5  ;;  %2451 = vmatpush1.msra.mxu1 %v2350_v23  ;;  %v2366_v39 = vsel %vm1412_vm14, %v4311_v5, %v4306_v54  ;;  %v2367_v40 = vsel %vm1412_vm14, %v4312_v63, %v4307_v21  ;;  %v2362_v7 = vpop.permute.xlu0 %2361 }
 0xc38   : > { %v4064_v42 = vpack.c.bf16 %v2364_v38, %v2363_v6  ;;  %v2356_v10 = vpop.permute.xlu1 %2355  ;;  %3343 = vmatmul.mubr.msk.f32.vlgmr.msra.gmra.mrb[12].mxu1 %vm1419_vm12, %v1166_v58  ;;  %v4062_v43 = vpack.c.bf16 %v2367_v40, %v2366_v39 }
 0xc39   : > { %2584 = vmatprep.mubr.f32.mxu1 %v4409_v45  ;;  %v2368_v44 = vsel %vm1412_vm14, %v2362_v7, %v2356_v10  ;;  %v2365_v29 = vsel %vm1412_vm14, %v2356_v10, %v2362_v7 }
 0xc3a   : > { %4063 = vmatprep.subr.bf16.mxu1 %v4062_v43 }
 0xc3b   : > { %4065 = vmatpush1.bf16.msra.mxu1 %v4064_v42 }
 0xc3c   : > { %2524 = vmatprep.subr.mxu1 %v2368_v44 }
 0xc3f   : > { %2525 = vmatpush1.msra.mxu1 %v2365_v29 }
 0xc40   : > { %3344 = vmatmul.mubr.msk.f32.vlgmr.msra.gmra.mrb[12].mxu1 %vm1419_vm12, %v1168_v26  ;;  %4099 = vmatprep.subr.bf16.mxu1 %v4484_v4 }
 0xc41   : > { %4101 = vmatpush3.bf16.msra.mxu1 %v4499_v8 }
 0xc42   : > { %4103 = vmatprep.subr.bf16.mxu1 %v4509_v12 }
 0xc45   : > { %4105 = vmatpush3.bf16.msra.mxu1 %v4522_v17 }
 0xc46   : > { %4107 = vmatprep.subr.bf16.mxu1 %v4531_v20 }
 0xc49   : > { %4109 = vmatpush3.bf16.msra.mxu1 %v4552_v31  ;;  %v2597_v27 = vpop.permute.xlu1 %2596 }
 0xc4a   : > { %4111 = vmatprep.subr.bf16.mxu1 %v4561_v35 }
 0xc4d   : > { %4113 = vmatpush3.bf16.msra.mxu1 %v4594_v50 }
 0xc4e   : > { %4115 = vmatprep.subr.bf16.mxu1 %v4606_v55 }
 0xc51   : > { %4117 = vmatpush3.bf16.msra.mxu1 %v4608_v56 }
 0xc52   : > { %4119 = vmatprep.subr.bf16.mxu1 %v4621_v61 }
 0xc55   : > { %4121 = vmatpush3.bf16.msra.mxu1 %v4623_v62 }
 0xc56   : > { %4123 = vmatprep.subr.bf16.mxu1 %v4633_v3 }
 0xc59   : > { %4125 = vmatpush3.bf16.msra.mxu1 %v4643_v13 }
 0xc5a   : > { %4127 = vmatprep.subr.bf16.mxu1 %v4645_v14 }
 0xc5d   : > { %4129 = vmatpush3.bf16.msra.mxu1 %v4647_v18 }
 0xc5e   : > { %4143 = vmatprep.subr.bf16.mxu1 %v4484_v4 }
 0xd13   : > { %v2586_v24 = vpop.f32.mrb[12].mxu1 }
 0xd14   : > { %v2599_v32 = vadd.f32 %v2597_v27, %v2586_v24  ;;  %v2588_v60 = vpop.f32.mrb[13].mxu1 }
 0xd15   : > { %v2600_v41 = vadd.f32 %v2597_v27, %v2588_v60 }
 0xd16   : > { %v2671_v47 = vmul.f32 %v2599_v32, %v2599_v32 }
 0xd17   : > { %2665 = vmatprep.mubr.f32.mxu0 %v2600_v41  ;;  %v2672_v46 = vmul.f32 %v2600_v41, %v2600_v41 }
 0xd18   : > { %2666 = vmatmul.mubr.f32.vlgmr.msra.gmra.mrb[14].mxu0 %v2599_v32 }
 0xd19   : > { %2737 = vmatprep.mubr.f32.mxu1 %v2672_v46  ;;  %2909 = vmatprep.mubr.f32.mxu0 %v4409_v45 }
 0xd1a   : > { %2738 = vmatmul.mubr.f32.vlgmr.msra.gmra.mrb[14].mxu1 %v2671_v47 }
 0xd1b   : > { %4145 = vmatpush3.bf16.msra.mxu1 %v4499_v8 }
 0xd1c   : > { %4147 = vmatprep.subr.bf16.mxu1 %v4509_v12 }
 0xd1f   : > { %4149 = vmatpush3.bf16.msra.mxu1 %v4522_v17 }
 0xd20   : > { %4151 = vmatprep.subr.bf16.mxu1 %v4531_v20 }
 0xd23   : > { %4153 = vmatpush3.bf16.msra.mxu1 %v4552_v31 }
 0xd24   : > { %4155 = vmatprep.subr.bf16.mxu1 %v4561_v35 }
 0xd27   : > { %4157 = vmatpush3.bf16.msra.mxu1 %v4594_v50 }
 0xd28   : > { %4159 = vmatprep.subr.bf16.mxu1 %v4606_v55 }
 0xd2b   : > { %4161 = vmatpush3.bf16.msra.mxu1 %v4608_v56  ;;  %v325_v56 = vld [vmem:[%s5336_s2 + $0x28] sm:$0xff] }
 0xd2c   : > { %4163 = vmatprep.subr.bf16.mxu1 %v4621_v61 }
 0xd2f   : > { %4165 = vmatpush3.bf16.msra.mxu1 %v4623_v62 }
 0xd30   : > { %4167 = vmatprep.subr.bf16.mxu1 %v4633_v3  ;;  %v329_v3 = vld [vmem:[%s5336_s2 + $0x48] sm:$0xff] }
 0xd33   : > { %4169 = vmatpush3.bf16.msra.mxu1 %v4643_v13 }
 0xd34   : > { %4171 = vmatprep.subr.bf16.mxu1 %v4645_v14 }
 0xd37   : > { %4173 = vmatpush3.bf16.msra.mxu1 %v4647_v18 }
 0xdeb   : > { %v3674_v4 = vpop.f32.mrb[14].mxu0 }
 0xdec   : > { %v3675_v8 = vpop.f32.mrb[15].mxu0 }
 0xded   : > { %v3676_v12 = vadd.f32 %v3675_v8, %v3674_v4  ;;  %v3709_v17 = vpop.f32.mrb[14].mxu1  ;;  %v1170_v4 = vld [vmem:[%s5338_s4 + $0x50] sm:$0xff] }
 0xdee   : > { %v3710_v20 = vpop.f32.mrb[15].mxu1 }
 0xdef   : > { %v2743_v31 = vmul.f32 %v3676_v12, %v3676_v12  ;;  %v3711_v35 = vadd.f32 %v3710_v20, %v3709_v17 }
 0xdf1   : > { %v2744_v50 = vsub.f32 %v3711_v35, %v2743_v31 }
 0xdf3   : > { %v2745_v55 = vadd.f32 1e-05, %v2744_v50 }
 0xdf5   : > { %4384 = vrsqrt.f32 %v2745_v55 }
 0xdff   : > { %v4385_v61 = vpop.eup %4384 }
 0xe00   : > { %v2747_v62 = vmul.f32 %v4385_v61, %v325_v56 }
 0xe02   : > { %2752 = vperm.xlu0 %4221, %v2747_v62   ;;  %v2748_v13 = vmul.f32 %v3676_v12, %v2747_v62 }
 0xe04   : > { %v2749_v14 = vsub.f32 %v329_v3, %v2748_v13 }
 0xe06   : > { %2759 = vperm.xlu1 %4222, %v2749_v14  }
 0xe81   : > { %v2753_v18 = vpop.permute.xlu0 %2752 }
 0xe82   : > { %v2755_v48 = vmul.f32 %v2753_v18, %v2599_v32  ;;  %v2756_v37 = vmul.f32 %v2753_v18, %v2600_v41 }
 0xe85   : > { %v2760_v51 = vpop.permute.xlu1 %2759 }
 0xe86   : > { %v2762_v52 = vadd.f32 %v2760_v51, %v2755_v48  ;;  %v2763_v30 = vadd.f32 %v2760_v51, %v2756_v37 }
 0xe88   : > { %v3345_v53 = vmul.f32 -1.442695, %v2762_v52  ;;  %v3346_v57 = vmul.f32 -1.442695, %v2763_v30 }
 0xe8a   : > { %4386 = vpow2.f32 %v3345_v53  ;;  %v1169_v53 = vld [vmem:[%s5338_s4 + $0x48] sm:$0xff] }
 0xe8b   : > { %4388 = vpow2.f32 %v3346_v57 }
 0xe94   : > { %v4387_v11 = vpop.eup %4386 }
 0xe95   : > { %v4389_v36 = vpop.eup %4388  ;;  %v2770_v59 = vadd.f32 1.0, %v4387_v11 }
 0xe96   : > { %v2771_v0 = vadd.f32 1.0, %v4389_v36 }
 0xe97   : > { %4390 = vrcp.f32 %v2770_v59 }
 0xe98   : > { %4392 = vrcp.f32 %v2771_v0 }
 0xea1   : > { %v4391_v2 = vpop.eup %4390 }
 0xea2   : > { %v4393_v9 = vpop.eup %4392  ;;  %v2776_v19 = vmul.f32 %v4391_v2, %v2762_v52 }
 0xea3   : > { %v2777_v22 = vmul.f32 %v4393_v9, %v2763_v30 }
 0xea5   : > { %v4318_v16 = vpack.i.bf16 %v2777_v22, %v2776_v19 }
 0xea7   : > { %4319 = vrot.lane.b32.xlu1 %v4318_v16, %s4411_s18  ;;  %4314 = vrot.lane.b32.xlu0 %v4318_v16, %s4412_s19 }
 0xeab   : > { %2794 = vrot.lane.b32.xlu1 %v2777_v22, %s4413_s20  ;;  %2792 = vrot.lane.b32.xlu0 %v2776_v19, %s4413_s20 }
 0xeaf   : > { %2800 = vrot.lane.b32.xlu1 %v2777_v22, %s4414_s21  ;;  %2798 = vrot.lane.b32.xlu0 %v2776_v19, %s4414_s21 }
 0xf19   : > { %v4320_v15 = vpop.permute.xlu1 %4319  ;;  %v4315_v63 = vpop.permute.xlu0 %4314 }
 0xf1a   : > { %v4322_v5 = vunpack.i.h.bf16 %v4320_v15  ;;  %v4321_v28 = vunpack.i.l.bf16 %v4320_v15  ;;  %v4317_v21 = vunpack.i.h.bf16 %v4315_v63  ;;  %v4316_v54 = vunpack.i.l.bf16 %v4315_v63  ;;  %v1171_v15 = vld [vmem:[%s5338_s4 + $0x58] sm:$0xff] }
 0xf1c   : > { %v2788_v58 = vsel %vm1360_vm4, %v4321_v28, %v4322_v5  ;;  %v2789_v23 = vsel %vm1360_vm4, %v4322_v5, %v4321_v28  ;;  %v2782_v38 = vsel %vm1353_vm5, %v4316_v54, %v4317_v21  ;;  %v2783_v6 = vsel %vm1353_vm5, %v4317_v21, %v4316_v54 }
 0xf1d   : > { %v2795_v39 = vpop.permute.xlu1 %2794  ;;  %v2793_v40 = vpop.permute.xlu0 %2792  ;;  %v2791_v42 = vsel %vm1157_vm6, %v2783_v6, %v2788_v58  ;;  %v2790_v7 = vsel %vm1156_vm7, %v2782_v38, %v2789_v23 }
 0xf1e   : > { %v4328_v10 = vpack.i.bf16 %v2777_v22, %v2791_v42  ;;  %v4130_v43 = vpack.c.bf16 %v2777_v22, %v2791_v42  ;;  %v4323_v44 = vpack.i.bf16 %v2776_v19, %v2790_v7  ;;  %v4132_v26 = vpack.c.bf16 %v2776_v19, %v2790_v7  ;;  %v336_v7 = vld [vmem:[%s5336_s2 + $0x80] sm:$0xff] }
 0xf1f   : > { %v2796_v24 = vsel %vm1369_vm8, %v2793_v40, %v2795_v39  ;;  %v2797_v32 = vsel %vm1369_vm8, %v2795_v39, %v2793_v40 }
 0xf20   : > { %4329 = vrot.lane.b32.xlu1 %v4328_v10, %s4415_s22  ;;  %4131 = vmatprep.subr.bf16.mxu0 %v4130_v43 }
 0xf21   : > { %4324 = vrot.lane.b32.xlu0 %v4323_v44, %s4415_s22  ;;  %v2801_v29 = vpop.permute.xlu1 %2800  ;;  %v2799_v27 = vpop.permute.xlu0 %2798  ;;  %4133 = vmatpush1.bf16.msra.mxu0 %v4132_v26 }
 0xf22   : > { %v2802_v60 = vsel %vm1376_vm9, %v2799_v27, %v2801_v29  ;;  %v2803_v41 = vsel %vm1376_vm9, %v2801_v29, %v2799_v27 }
 0xf23   : > { %v2805_v46 = vsel %vm1159_vm10, %v2796_v24, %v2803_v41  ;;  %v2804_v47 = vsel %vm1158_vm11, %v2797_v32, %v2802_v60 }
 0xf24   : > { %2816 = vrot.lane.b32.xlu1 %v2805_v46, %s4415_s22  ;;  %2849 = vmatprep.subr.mxu0 %v2805_v46 }
 0xf25   : > { %2810 = vrot.lane.b32.xlu0 %v2804_v47, %s4415_s22  ;;  %2850 = vmatpush1.msra.mxu0 %v2804_v47 }
 0xf26   : > { %3347 = vmatmul.mubr.msk.f32.vlgmr.msra.gmra.mrb[16].mxu0 %vm1419_vm12, %v1170_v4 }
 0xf27   : > { %2983 = vmatprep.mubr.f32.mxu0 %v4409_v45 }
 0xf28   : > { %4339 = vrot.lane.b32.xlu1 %v4328_v10, %s4416_s25 }
 0xf29   : > { %4334 = vrot.lane.b32.xlu0 %v4323_v44, %s4416_s25 }
 0xf2c   : > { %2834 = vrot.lane.b32.xlu1 %v2805_v46, %s4416_s25 }
 0xf2d   : > { %2828 = vrot.lane.b32.xlu0 %v2804_v47, %s4416_s25 }
 0xf31   : > { %3068 = vperm.xlu0 %4221, %v333_v33  }
 0xf92   : > { %v4330_v1 = vpop.permute.xlu1 %4329 }
 0xf93   : > { %v4332_v8 = vunpack.i.h.bf16 %v4330_v1  ;;  %v4331_v12 = vunpack.i.l.bf16 %v4330_v1  ;;  %v4325_v17 = vpop.permute.xlu0 %4324 }
 0xf94   : > { %v4327_v20 = vunpack.i.h.bf16 %v4325_v17  ;;  %v4326_v31 = vunpack.i.l.bf16 %v4325_v17 }
 0xf96   : > { %v2822_v35 = vsel %vm1393_vm13, %v4332_v8, %v4327_v20  ;;  %v2821_v50 = vsel %vm1393_vm13, %v4331_v12, %v4326_v31  ;;  %v2817_v55 = vpop.permute.xlu1 %2816  ;;  %v2818_v56 = vsel %vm1393_vm13, %v4326_v31, %v4331_v12  ;;  %v2819_v61 = vsel %vm1393_vm13, %v4327_v20, %v4332_v8 }
 0xf97   : > { %v4136_v62 = vpack.c.bf16 %v2822_v35, %v2821_v50  ;;  %v2811_v3 = vpop.permute.xlu0 %2810  ;;  %v4134_v13 = vpack.c.bf16 %v2819_v61, %v2818_v56 }
 0xf98   : > { %v2820_v18 = vsel %vm1393_vm13, %v2811_v3, %v2817_v55  ;;  %v2823_v57 = vsel %vm1393_vm13, %v2817_v55, %v2811_v3 }
 0xf99   : > { %4135 = vmatprep.subr.bf16.mxu0 %v4134_v13 }
 0xf9a   : > { %4137 = vmatpush1.bf16.msra.mxu0 %v4136_v62  ;;  %v4340_v14 = vpop.permute.xlu1 %4339 }
 0xf9b   : > { %v4342_v48 = vunpack.i.h.bf16 %v4340_v14  ;;  %v4341_v37 = vunpack.i.l.bf16 %v4340_v14  ;;  %v4335_v51 = vpop.permute.xlu0 %4334  ;;  %2923 = vmatprep.subr.mxu0 %v2820_v18 }
 0xf9c   : > { %v4337_v52 = vunpack.i.h.bf16 %v4335_v51  ;;  %v4336_v30 = vunpack.i.l.bf16 %v4335_v51 }
 0xf9e   : > { %v2837_v11 = vsel %vm1412_vm14, %v4337_v52, %v4342_v48  ;;  %v2836_v36 = vsel %vm1412_vm14, %v4336_v30, %v4341_v37  ;;  %2924 = vmatpush1.msra.mxu0 %v2823_v57  ;;  %v2839_v59 = vsel %vm1412_vm14, %v4341_v37, %v4336_v30  ;;  %v2840_v0 = vsel %vm1412_vm14, %v4342_v48, %v4337_v52  ;;  %v2835_v9 = vpop.permute.xlu1 %2834 }
 0xf9f   : > { %v4140_v2 = vpack.c.bf16 %v2837_v11, %v2836_v36  ;;  %v2829_v19 = vpop.permute.xlu0 %2828  ;;  %3348 = vmatmul.mubr.msk.f32.vlgmr.msra.gmra.mrb[16].mxu0 %vm1419_vm12, %v1169_v53  ;;  %v4138_v22 = vpack.c.bf16 %v2840_v0, %v2839_v59 }
 0xfa0   : > { %3057 = vmatprep.mubr.f32.mxu0 %v4409_v45  ;;  %v2841_v16 = vsel %vm1412_vm14, %v2835_v9, %v2829_v19  ;;  %v2838_v63 = vsel %vm1412_vm14, %v2829_v19, %v2835_v9 }
 0xfa1   : > { %4139 = vmatprep.subr.bf16.mxu0 %v4138_v22 }
 0xfa2   : > { %4141 = vmatpush1.bf16.msra.mxu0 %v4140_v2 }
 0xfa3   : > { %2997 = vmatprep.subr.mxu0 %v2841_v16 }
 0xfa6   : > { %2998 = vmatpush1.msra.mxu0 %v2838_v63 }
 0xfa7   : > { %3349 = vmatmul.mubr.msk.f32.vlgmr.msra.gmra.mrb[16].mxu0 %vm1419_vm12, %v1171_v15 }
 0xfa8   : > { %3763 = vmatprep.mubr.msk.f32.mxu0 %vm3149_vm15, %v3147_v49 }
 0xfb0   : > { %v3069_v5 = vpop.permute.xlu0 %3068 }
0x107a   : > { %v3059_v28 = vpop.f32.mrb[16].mxu0 }
0x107b   : > { %v3071_v21 = vadd.f32 %v3069_v5, %v3059_v28  ;;  %v3061_v45 = vpop.f32.mrb[17].mxu0 }
0x107c   : > { %v3072_v54 = vadd.f32 %v3069_v5, %v3061_v45 }
0x107d   : > { %v3073_v58 = vadd.f32 %v3071_v21, %v5078_v25  ;;  %v3148_v25 = vld [vmem:[%s5340_s6 + $0x8] sm:$0x1] }
0x107e   : > { %v3074_v23 = vadd.f32 %v3072_v54, %v5080_v34  ;;  %v337_v34 = vld [vmem:[%s5336_s2 + $0x88] sm:$0xff] }
0x107f   : > { %v3075_v6 = vmul.f32 0.70710677, %v3073_v58 }
0x1080   : > { %v3076_v38 = vmul.f32 0.70710677, %v3074_v23 }
0x1082   : > { %3141 = vmatprep.mubr.f32.mxu1 %v3076_v38 }
0x1083   : > { %3142 = vmatmul.mubr.f32.vlgmr.msra.gmra.mrb[16].mxu1 %v3075_v6 }
0x1156   : > { %v3744_v39 = vpop.f32.mrb[16].mxu1 }
0x1157   : > { %v3745_v40 = vpop.f32.mrb[17].mxu1 }
0x1158   : > { %v3746_v42 = vadd.f32 %v3745_v40, %v3744_v39 }
0x115a   : > { %3761 = vmatprep.subr.mxu0 %v3746_v42 }
0x115b   : > { %3762 = vmatpush3.msra.mxu0 %v3746_v42 }
0x115c   : > { %3764 = vmatmul.mubr.msk.f32.vlgmr.msra.gmra.mrb[18].mxu0 %vm3149_vm15, %v3148_v25 }
0x122f   : > { %v3765_v10 = vpop.f32.mrb[18].mxu0 }
0x1230   : > { %v3228_v43 = vadd.f32 %v3765_v10, %v337_v34  ;;  %v3222_v44 = vpop.f32.mrb[19].mxu0 }
0x1231   : > { %v3223_v26 = vadd.f32 %v3222_v44, %v336_v7 }
0x1232   : > { %3234 = vst.msk [vmem:[%s319_s15 + $0x8] sm:$0x1] %vm3233_vm1, %v3228_v43 }
0x1233   : > { %3232 = vst.msk [vmem:[%s319_s15] sm:$0xff] %vm3231_vm2, %v3223_v26 }
0x1234 PF: > { %s18_s27 = sadd.s32 1, %s4400_s27  }
0x1235   : > { %p15_p4 = scmp.ge.s32.totalorder %s18_s27, 4  }
0x1237   :  { %17 = sbr.rel (!%p15_p4) target bundleno = 1 (0x1), region = 85 }

</bundles_post_ra>
